<compile_context>
chip_gen: v7x
topology: tpu7x:2x2x1
jax: 0.10.0
libtpu: 0.0.40
codegen_flags: <defaults>
</compile_context>

<pallas_src>
import functools
import math

import numpy as np

import jax
import jax.numpy as jnp
from jax import lax
from jax.experimental import pallas as pl
from jax.experimental.pallas import tpu as pltpu


_TIME_BLOCK_CAP = 16                 # timesteps per sequential grid step
_SINGLE_BUFFER_WEIGHT_BYTES = 8 << 20  # single-buffer constant-index weights above this


def _round_up(x, m):
    return (x + m - 1) // m * m


def _nbytes(a):
    return int(a.size) * a.dtype.itemsize


def _unroll_for(Hs, TB):
    # Full unroll only while the per-step live set (h, c, n_gates*Hs-wide f32 pre and gate
    # temporaries per 8-row batch block) fits the 64 x 4 KiB vreg file; beyond that,
    # spills cost more than the loop overhead the unroll amortizes.
    if Hs <= 256:
        return TB
    if Hs <= 1024:
        for u in (4, 2):
            if TB % u == 0:
                return u
    return 1


def _batch_chunks(Bp):
    # Split the batch across TensorCores only on multi-TC chips (v4 megacore / v7x).
    # On single-TC chips (v5e/v6e) a split would just halve MXU row fill in the recurrence.
    try:
        kind = jax.devices()[0].device_kind.lower()
    except Exception:
        kind = ""
    multi_tc = ("v4" in kind) or ("v7" in kind) or ("7x" in kind)
    if multi_tc and Bp >= 16 and Bp % 16 == 0:
        return 2
    return 1


def _vmem_limit_bytes(est_bytes):
    """Scoped-VMEM limit derived from the actual block sizes, with headroom."""
    try:
        cap = int(pltpu.get_tpu_info().vmem_capacity_bytes)
    except Exception:
        cap = 64 << 20
    lim = max(32 << 20, int(est_bytes * 1.5) + (4 << 20))
    return max(min(lim, (cap * 3) // 4), 16 << 20)


def _cell_step(mode, pre, h, c, HB, prescaled=False):
    """Shared gate math (kernels use band width HB = Hs; the reference uses HB = H).

    Gate band order in `pre`: LSTM [G | I | F | O]; GRU [Z | G]; RNN_*: single band.
    The module's own GRUCell computes a reset gate but never uses it, so it is omitted
    here on purpose (this matches the PyTorch spec, not torch.nn.GRU).
    sigmoid(x) = 0.5*tanh(0.5*x)+0.5 (one EUP op); with `prescaled` the 0.5*x is already
    folded into the sigmoid-gate weights/bias.
    """
    if prescaled:
        sig = lambda v: 0.5 * jnp.tanh(v) + 0.5
    else:
        sig = lambda v: 0.5 * jnp.tanh(0.5 * v) + 0.5
    if mode == "LSTM":
        g = jnp.tanh(pre[:, 0 * HB:1 * HB])
        i = sig(pre[:, 1 * HB:2 * HB])
        f = sig(pre[:, 2 * HB:3 * HB])
        o = sig(pre[:, 3 * HB:4 * HB])
        c_new = f * c + i * g
        h_new = o * jnp.tanh(c_new)
        return h_new, c_new
    if mode == "GRU":
        z = sig(pre[:, 0 * HB:1 * HB])
        g = jnp.tanh(pre[:, 1 * HB:2 * HB])
        return z * h + (1.0 - z) * g, None
    if mode == "RNN_TANH":
        return jnp.tanh(pre[:, :HB]), None
    if mode == "RNN_RELU":
        return jnp.maximum(pre[:, :HB], 0.0), None
    raise ValueError("Invalid RNN mode selected.")


# ---------------------------------------------------------------------------
# Kernels
# ---------------------------------------------------------------------------

def _recurrent_body(x_ref, wx_ref, b_ref, wh_ref, pre_scr, h_scr, c_scr, *,
                    mode, HB, TB, S_real, guard, unroll, store_step, pad_store):
    """TB recurrent steps for one (batch-chunk, time-block) grid point.

    The x-projection for the whole block is one fused GEMM into VMEM scratch (no f32
    `pre` round-trip to HBM); padded timesteps (when S was rounded up to a multiple of
    TB) are skipped under pl.when so the recurrent state stays exact.
    """
    @pl.when(pl.program_id(1) == 0)
    def _init():
        h_scr[...] = jnp.zeros_like(h_scr)
        if c_scr is not None:
            c_scr[...] = jnp.zeros_like(c_scr)

    BB, Din = x_ref.shape[1], x_ref.shape[2]
    GWp = pre_scr.shape[-1]

    # Fused input projection: (TB*BB, Din) @ (Din, GWp) on the MXU, bias (bx+bh, sigmoid
    # gates pre-scaled by 0.5) folded in. f32 accumulation, result kept in VMEM scratch.
    x2 = x_ref[...].reshape(TB * BB, Din).astype(wx_ref.dtype)
    pre_scr[...] = (jnp.dot(x2, wx_ref[...], preferred_element_type=jnp.float32)
                    + b_ref[...]).reshape(TB, BB, GWp)

    wh = wh_ref[...]                      # (Hs, GWp) bf16, VMEM-resident
    t0 = pl.program_id(1) * TB

    def do_step(t):
        h = h_scr[...]
        pre = pre_scr[t] + jnp.dot(h.astype(wh.dtype), wh,
                                   preferred_element_type=jnp.float32)
        c = c_scr[...] if c_scr is not None else None
        h_new, c_new = _cell_step(mode, pre, h, c, HB, prescaled=True)
        if c_new is not None:
            c_scr[...] = c_new
        h_scr[...] = h_new
        if store_step is not None:
            store_step(t, h_new)

    def step(t, carry):
        if guard:
            @pl.when(t0 + t < S_real)
            def _():
                do_step(t)

            if pad_store is not None:
                @pl.when(t0 + t >= S_real)
                def _():
                    pad_store(t)
        else:
            do_step(t)
        return carry

    lax.fori_loop(0, TB, step, 0, unroll=unroll)


def _layer_seq_kernel(x_ref, wx_ref, b_ref, wh_ref, hseq_ref, pre_scr, h_scr, *maybe_c,
                      mode, HB, TB, S_real, guard, unroll):
    """Non-last layer: emit the bf16 hidden sequence block (padded steps written as 0)."""
    c_scr = maybe_c[0] if maybe_c else None

    def store_step(t, h_new):
        hseq_ref[t] = h_new.astype(hseq_ref.dtype)

    def pad_store(t):
        hseq_ref[t] = jnp.zeros(hseq_ref.shape[1:], hseq_ref.dtype)

    _recurrent_body(x_ref, wx_ref, b_ref, wh_ref, pre_scr, h_scr, c_scr,
                    mode=mode, HB=HB, TB=TB, S_real=S_real, guard=guard, unroll=unroll,
                    store_step=store_step, pad_store=pad_store)


def _layer_last_kernel(x_ref, wx_ref, b_ref, wh_ref, wfc_ref, bfc_ref, out_ref,
                       pre_scr, h_scr, *maybe_c, mode, HB, TB, S_real, guard, unroll):
    """Last layer: keep only the running hidden state; fuse fc(h_last) on the final step
    (no (S,B,H) sequence is written to HBM and there is no separate FC pallas_call)."""
    c_scr = maybe_c[0] if maybe_c else None
    _recurrent_body(x_ref, wx_ref, b_ref, wh_ref, pre_scr, h_scr, c_scr,
                    mode=mode, HB=HB, TB=TB, S_real=S_real, guard=guard, unroll=unroll,
                    store_step=None, pad_store=None)

    @pl.when(pl.program_id(1) == pl.num_programs(1) - 1)
    def _finalize():
        out_ref[...] = (jnp.dot(h_scr[...].astype(wfc_ref.dtype), wfc_ref[...],
                                preferred_element_type=jnp.float32) + bfc_ref[...])


# ---------------------------------------------------------------------------
# pallas_call wrapper (one call per layer)
# ---------------------------------------------------------------------------

def _run_layer(mode, x_seq, wx, b, wh, Hs, S_real, *, TB, NB, last,
               wfc=None, bfc=None, out_dtype=jnp.bfloat16):
    """x_seq: (S_pad, Bp, Din).  Returns the bf16 hidden sequence (S_pad, Bp, Hs), or for
    the last layer fc(h_last) as (Bp, Op) f32."""
    S_pad, Bp, Din = x_seq.shape
    GWp = wx.shape[1]
    NT = S_pad // TB
    BB = Bp // NB
    guard = (S_pad != S_real)
    unroll = _unroll_for(Hs, TB)

    # Constant-index weight blocks: single-buffer once large enough for double buffering
    # to matter for VMEM capacity (v7x: 64 MiB).
    w_bytes = _nbytes(wx) + _nbytes(wh) + _nbytes(b)
    if last:
        w_bytes += _nbytes(wfc) + _nbytes(bfc)
    single_w = w_bytes > _SINGLE_BUFFER_WEIGHT_BYTES
    wbuf = 1 if single_w else 2

    def const_spec(shape):
        kw = {"pipeline_mode": pl.Buffered(1)} if single_w else {}
        return pl.BlockSpec(shape, lambda bi, ti: (0, 0), **kw)

    in_specs = [pl.BlockSpec((TB, BB, Din), lambda bi, ti: (ti, bi, 0)),
                const_spec(wx.shape), const_spec(b.shape), const_spec(wh.shape)]
    operands = [x_seq, wx, b, wh]

    if last:
        Op = wfc.shape[1]
        in_specs += [const_spec(wfc.shape), const_spec(bfc.shape)]
        operands += [wfc, bfc]
        out_shape = jax.ShapeDtypeStruct((Bp, Op), jnp.float32)
        out_specs = pl.BlockSpec((BB, Op), lambda bi, ti: (bi, 0))
        out_block_bytes = BB * Op * 4
        kernel = functools.partial(_layer_last_kernel, mode=mode, HB=Hs, TB=TB,
                                   S_real=S_real, guard=guard, unroll=unroll)
    else:
        out_shape = jax.ShapeDtypeStruct((S_pad, Bp, Hs), out_dtype)
        out_specs = pl.BlockSpec((TB, BB, Hs), lambda bi, ti: (ti, bi, 0))
        out_block_bytes = TB * BB * Hs * np.dtype(out_dtype).itemsize
        kernel = functools.partial(_layer_seq_kernel, mode=mode, HB=Hs, TB=TB,
                                   S_real=S_real, guard=guard, unroll=unroll)

    scratch = [pltpu.VMEM((TB, BB, GWp), jnp.float32),      # fused pre-activations
               pltpu.VMEM((BB, Hs), jnp.float32)]           # h (f32 across steps)
    if mode == "LSTM":
        scratch.append(pltpu.VMEM((BB, Hs), jnp.float32))   # c

    est = (w_bytes * wbuf
           + 2 * TB * BB * Din * x_seq.dtype.itemsize       # double-buffered x block
           + 2 * out_block_bytes                            # double-buffered out block
           + TB * BB * GWp * 4                              # pre scratch
           + (2 if mode == "LSTM" else 1) * BB * Hs * 4)    # state scratch

    return pl.pallas_call(
        kernel,
        out_shape=out_shape,
        grid_spec=pltpu.PrefetchScalarGridSpec(
            num_scalar_prefetch=0,
            grid=(NB, NT),
            in_specs=in_specs,
            out_specs=out_specs,
            scratch_shapes=scratch),
        compiler_params=pltpu.CompilerParams(
            dimension_semantics=("parallel", "arbitrary"),   # batch chunks | time blocks
            vmem_limit_bytes=_vmem_limit_bytes(est)),
    )(*operands)


# ---------------------------------------------------------------------------
# Model: deterministic parameter construction + forward
# ---------------------------------------------------------------------------

class RNNModelPallas:
    # Gate band order matches _cell_step: LSTM [G,I,F,O]; GRU [Z,G]; RNN single band.
    _N_GATES = {"LSTM": 4, "GRU": 2, "RNN_TANH": 1, "RNN_RELU": 1}
    _SIG_GATES = {"LSTM": (1, 2, 3), "GRU": (0,), "RNN_TANH": (), "RNN_RELU": ()}

    def __init__(self, mode, input_size, hidden_size, num_layers, bias,
                 output_size, key, param_dtype=jnp.bfloat16):
        if mode not in self._N_GATES:
            raise ValueError("Invalid RNN mode selected.")
        self.mode = mode
        self.input_size = input_size
        self.hidden_size = hidden_size
        self.num_layers = num_layers
        self.bias = bias
        self.output_size = output_size
        self.param_dtype = param_dtype

        H = hidden_size
        # State width: unpadded for H < 128 (gates packed contiguously -> no per-gate
        # 128-lane padding waste at small H), lane-aligned otherwise.
        Hs = H if H < 128 else _round_up(H, 128)
        self.Hs = Hs
        n_gates = self._N_GATES[mode]
        sig_gates = self._SIG_GATES[mode]
        GWp = _round_up(n_gates * Hs, 128)
        std = 1.0 / math.sqrt(H)

        def init_linear(k, in_f, out_f, use_bias):
            kw, kb = jax.random.split(k)
            w = jax.random.uniform(kw, (out_f, in_f), jnp.float32, -std, std)
            if use_bias:
                b_ = jax.random.uniform(kb, (out_f,), jnp.float32, -std, std)
            else:
                b_ = jnp.zeros((out_f,), jnp.float32)
            return w, b_

        self.layers = []      # padded / packed params used by the kernels
        self.layers_ref = []  # unpadded params used by the pure-JAX reference
        for layer in range(num_layers):
            d_in = input_size if layer == 0 else H
            d_in_s = input_size if layer == 0 else Hs
            wx_p = jnp.zeros((d_in_s, GWp), jnp.float32)
            wh_p = jnp.zeros((Hs, GWp), jnp.float32)
            b_p = jnp.zeros((1, GWp), jnp.float32)
            wxs, whs, bs = [], [], []
            for g in range(n_gates):
                key, k1, k2 = jax.random.split(key, 3)
                w_x, b_x = init_linear(k1, d_in, H, bias)
                w_h, b_h = init_linear(k2, H, H, bias)
                b_sum = b_x + b_h                    # pre-summed biases
                # Fold the 0.5 sigmoid pre-scale into sigmoid-gate weights/bias at init
                # (power-of-two scaling -> exact in bf16/f32, frees a VPU mul per step).
                scale = 0.5 if g in sig_gates else 1.0
                wx_p = wx_p.at[:d_in, g * Hs:g * Hs + H].set(w_x.T * scale)
                wh_p = wh_p.at[:H, g * Hs:g * Hs + H].set(w_h.T * scale)
                b_p = b_p.at[0, g * Hs:g * Hs + H].set(b_sum * scale)
                wxs.append(w_x.T)
                whs.append(w_h.T)
                bs.append(b_sum)
            self.layers.append((wx_p.astype(param_dtype),
                                wh_p.astype(param_dtype), b_p))
            self.layers_ref.append((jnp.concatenate(wxs, axis=1),
                                    jnp.concatenate(whs, axis=1),
                                    jnp.concatenate(bs).reshape(1, n_gates * H)))

        # Final fc (fused into the last layer's kernel). nn.Linear always has a bias.
        # TODO(synk): att_fc exists in the PyTorch module but is never used in forward().
        key, kf = jax.random.split(key)
        w_fc, b_fc = init_linear(kf, H, output_size, True)
        Op = _round_up(output_size, 128)
        self.w_fc_p = (jnp.zeros((Hs, Op), jnp.float32)
                       .at[:H, :output_size].set(w_fc.T).astype(param_dtype))
        self.b_fc_p = jnp.zeros((1, Op), jnp.float32).at[0, :output_size].set(b_fc)
        self.w_fc_ref = w_fc.T
        self.b_fc_ref = b_fc.reshape(1, output_size)

    # ---------------- Pallas forward ----------------
    def __call__(self, x):
        # x: (B, S, input_size) -> (B, output_size); batch dim squeezed when B == 1,
        # matching .squeeze() in the PyTorch reference. hx is always None in the
        # reference forward, so external initial state is not supported.
        B, S, _ = x.shape
        Bp = _round_up(B, 8)                 # sublane-dense batch
        TB = min(S, _TIME_BLOCK_CAP)
        S_pad = _round_up(S, TB)             # back-pad awkward S; padded steps are
                                             # skipped in-kernel via pl.when guards
        NB = _batch_chunks(Bp)
        Hs = self.Hs

        # Layer-0 input already in bf16 (the kernels cast before the MXU anyway).
        seq = jnp.transpose(x, (1, 0, 2)).astype(jnp.bfloat16)    # (S, B, D)
        if S_pad != S or Bp != B:
            # NOTE: padded batch rows pick up bias-driven state; rows are independent and
            # sliced off below, so this is harmless (never reduce over the batch dim!).
            seq = jnp.pad(seq, ((0, S_pad - S), (0, Bp - B), (0, 0)))

        out_pad = None
        n = len(self.layers)
        for li, (wx, wh, b) in enumerate(self.layers):
            if li < n - 1:
                seq = _run_layer(self.mode, seq, wx, b, wh, Hs, S,
                                 TB=TB, NB=NB, last=False)                 # (S_pad,Bp,Hs) bf16
            else:
                out_pad = _run_layer(self.mode, seq, wx, b, wh, Hs, S,
                                     TB=TB, NB=NB, last=True,
                                     wfc=self.w_fc_p, bfc=self.b_fc_p)     # (Bp, Op) f32
        out = out_pad[:B, :self.output_size]
        if B == 1:
            out = out[0]
        return out

    # ---------------- pure-JAX reference (same math, unpadded, unscaled) ----------------
    def reference(self, x):
        H = self.hidden_size
        pd = self.param_dtype
        B = x.shape[0]
        seq = jnp.transpose(x, (1, 0, 2)).astype(jnp.float32)     # (S, B, D)
        outs = []
        for (wx, wh, b) in self.layers_ref:
            h = jnp.zeros((B, H), jnp.float32)
            c = jnp.zeros((B, H), jnp.float32)
            outs = []
            for t in range(seq.shape[0]):
                pre = (jnp.dot(seq[t].astype(pd), wx.astype(pd),
                               preferred_element_type=jnp.float32)
                       + jnp.dot(h.astype(pd), wh.astype(pd),
                                 preferred_element_type=jnp.float32)
                       + b)
                h, c_new = _cell_step(self.mode, pre, h, c, H, prescaled=False)
                if c_new is not None:
                    c = c_new
                outs.append(h)
            seq = jnp.stack(outs)
        out = outs[-1]
        out = (jnp.dot(out.astype(pd), self.w_fc_ref.astype(pd),
                       preferred_element_type=jnp.float32) + self.b_fc_ref)
        if B == 1:
            out = out[0]
        return out


if __name__ == "__main__":
    D, H, L, O = 16, 32, 2, 8
    key = jax.random.PRNGKey(0)
    kx1, kx2, kp = jax.random.split(key, 3)
    # Friendly shape (S divides the time block) and an awkward one (S=19 exercises the
    # back-padding + pl.when guard path).
    x_a = jax.random.normal(kx1, (2, 8, D), jnp.float32)
    x_b = jax.random.normal(kx2, (2, 19, D), jnp.float32)

    ok = True
    for mode in ("LSTM", "GRU", "RNN_TANH", "RNN_RELU"):
        model = RNNModelPallas(mode, D, H, L, True, O, kp)
        for x in (x_a, x_b):
            out = jax.block_until_ready(model(x))
            ref = model.reference(x)
            assert out.shape == (x.shape[0], O), (mode, out.shape)
            if not bool(jnp.allclose(out, ref, atol=2e-3, rtol=2e-3)):
                ok = False
                print(mode, tuple(x.shape), "mismatch, max abs diff =",
                      float(jnp.max(jnp.abs(out - ref))))
    if ok:
        print("KERNEL_OK")
</pallas_src>

<mosaic_0001>
module attributes {stable_mosaic.version = 11 : i64} {
  func.func @_layer_seq_kernel(%arg0: i32, %arg1: i32, %arg2: memref<8x8x16xbf16, #tpu.memory_space<vmem>>, %arg3: memref<16x128xbf16, #tpu.memory_space<vmem>>, %arg4: memref<1x128xf32, #tpu.memory_space<vmem>>, %arg5: memref<32x128xbf16, #tpu.memory_space<vmem>>, %arg6: memref<8x8x32xbf16, #tpu.memory_space<vmem>>, %arg7: memref<8x8x128xf32, #tpu.memory_space<vmem>>, %arg8: memref<8x32xf32, #tpu.memory_space<vmem>>, %arg9: memref<8x32xf32, #tpu.memory_space<vmem>>) attributes {dimension_semantics = [#tpu.dimension_semantics<parallel>, #tpu.dimension_semantics<arbitrary>], iteration_bounds = array<i64: 1, 1>, scalar_prefetch = 0 : i64, scratch_operands = 3 : i64, tpu.core_type = #tpu.core_type<tc>, window_params = [{transform_indices = @transform_0, window_bounds = array<i64: 8, 8, 16>}, {pipeline_mode = #tpu.pipeline_mode<synchronous>, transform_indices = @transform_1, window_bounds = array<i64: 16, 128>}, {pipeline_mode = #tpu.pipeline_mode<synchronous>, transform_indices = @transform_2, window_bounds = array<i64: 1, 128>}, {pipeline_mode = #tpu.pipeline_mode<synchronous>, transform_indices = @transform_3, window_bounds = array<i64: 32, 128>}, {transform_indices = @transform_4, window_bounds = array<i64: 8, 8, 32>}]} {
    %c0_i32 = arith.constant 0 : i32
    %0 = arith.cmpi eq, %arg1, %c0_i32 : i32
    %1 = arith.extui %0 : i1 to i32
    %c0_i32_0 = arith.constant 0 : i32
    %2 = arith.cmpi ne, %1, %c0_i32_0 : i32
    scf.if %2 {
      %cst_165 = arith.constant 0.000000e+00 : f32
      %333 = vector.broadcast %cst_165 : f32 to vector<8x32xf32>
      %c0_166 = arith.constant 0 : index
      %c0_167 = arith.constant 0 : index
      %334 = vector.load %arg8[%c0_166, %c0_167] : memref<8x32xf32, #tpu.memory_space<vmem>>, vector<8x32xf32>
      tpu.vector_store %arg8[%c0_166, %c0_167], %333 {strides = array<i32>} : memref<8x32xf32, #tpu.memory_space<vmem>>, vector<8x32xf32>,
      %cst_168 = arith.constant 0.000000e+00 : f32
      %335 = vector.broadcast %cst_168 : f32 to vector<8x32xf32>
      %c0_169 = arith.constant 0 : index
      %c0_170 = arith.constant 0 : index
      %336 = vector.load %arg9[%c0_169, %c0_170] : memref<8x32xf32, #tpu.memory_space<vmem>>, vector<8x32xf32>
      tpu.vector_store %arg9[%c0_169, %c0_170], %335 {strides = array<i32>} : memref<8x32xf32, #tpu.memory_space<vmem>>, vector<8x32xf32>,
    } else {
    }
    %c0 = arith.constant 0 : index
    %c0_1 = arith.constant 0 : index
    %c0_2 = arith.constant 0 : index
    %3 = vector.load %arg2[%c0, %c0_1, %c0_2] : memref<8x8x16xbf16, #tpu.memory_space<vmem>>, vector<8x8x16xbf16>
    %4 = vector.shape_cast %3 : vector<8x8x16xbf16> to vector<64x16xbf16>
    %c0_3 = arith.constant 0 : index
    %c0_4 = arith.constant 0 : index
    %5 = vector.load %arg3[%c0_3, %c0_4] : memref<16x128xbf16, #tpu.memory_space<vmem>>, vector<16x128xbf16>
    %cst = arith.constant dense<0.000000e+00> : vector<64x128xf32>
    %6 = tpu.matmul %4, %5, %cst {dimension_numbers = #tpu.dot_dimension_numbers<[1], [0], [0], [1], [0, 0, 1, 1], [], []>} : vector<64x16xbf16>, vector<16x128xbf16>, vector<64x128xf32> -> vector<64x128xf32>
    %c0_5 = arith.constant 0 : index
    %c0_6 = arith.constant 0 : index
    %7 = vector.load %arg4[%c0_5, %c0_6] : memref<1x128xf32, #tpu.memory_space<vmem>>, vector<1x128xf32>
    %8 = vector.broadcast %7 : vector<1x128xf32> to vector<64x128xf32>
    %9 = arith.addf %6, %8 : vector<64x128xf32>
    %10 = vector.shape_cast %9 : vector<64x128xf32> to vector<8x8x128xf32>
    %c0_7 = arith.constant 0 : index
    %c0_8 = arith.constant 0 : index
    %c0_9 = arith.constant 0 : index
    %11 = vector.load %arg7[%c0_7, %c0_8, %c0_9] : memref<8x8x128xf32, #tpu.memory_space<vmem>>, vector<8x8x128xf32>
    tpu.vector_store %arg7[%c0_7, %c0_8, %c0_9], %10 {strides = array<i32>} : memref<8x8x128xf32, #tpu.memory_space<vmem>>, vector<8x8x128xf32>,
    %c0_10 = arith.constant 0 : index
    %c0_11 = arith.constant 0 : index
    %12 = vector.load %arg5[%c0_10, %c0_11] : memref<32x128xbf16, #tpu.memory_space<vmem>>, vector<32x128xbf16>
    %c0_i32_12 = arith.constant 0 : i32
    %c0_13 = arith.constant 0 : index
    %c0_14 = arith.constant 0 : index
    %13 = vector.load %arg8[%c0_13, %c0_14] : memref<8x32xf32, #tpu.memory_space<vmem>>, vector<8x32xf32>
    %14 = arith.index_cast %c0_i32_12 : i32 to index
    %c0_15 = arith.constant 0 : index
    %c0_16 = arith.constant 0 : index
    %15 = vector.load %arg7[%14, %c0_15, %c0_16] : memref<8x8x128xf32, #tpu.memory_space<vmem>>, vector<1x8x128xf32>
    %16 = vector.shape_cast %15 : vector<1x8x128xf32> to vector<8x128xf32>
    %17 = arith.truncf %13 : vector<8x32xf32> to vector<8x32xbf16>
    %cst_17 = arith.constant dense<0.000000e+00> : vector<8x128xf32>
    %18 = tpu.matmul %17, %12, %cst_17 {dimension_numbers = #tpu.dot_dimension_numbers<[1], [0], [0], [1], [0, 0, 1, 1], [], []>} : vector<8x32xbf16>, vector<32x128xbf16>, vector<8x128xf32> -> vector<8x128xf32>
    %19 = arith.addf %16, %18 : vector<8x128xf32>
    %c0_18 = arith.constant 0 : index
    %c0_19 = arith.constant 0 : index
    %20 = vector.load %arg9[%c0_18, %c0_19] : memref<8x32xf32, #tpu.memory_space<vmem>>, vector<8x32xf32>
    %21 = vector.extract_strided_slice %19 {offsets = [0, 0], sizes = [8, 32], strides = [1, 1]} : vector<8x128xf32> to vector<8x32xf32>
    %22 = math.tanh %21 : vector<8x32xf32>
    %23 = vector.extract_strided_slice %19 {offsets = [0, 32], sizes = [8, 32], strides = [1, 1]} : vector<8x128xf32> to vector<8x32xf32>
    %24 = math.tanh %23 : vector<8x32xf32>
    %cst_20 = arith.constant 5.000000e-01 : f32
    %25 = vector.broadcast %cst_20 : f32 to vector<8x32xf32>
    %26 = arith.mulf %25, %24 : vector<8x32xf32>
    %cst_21 = arith.constant 5.000000e-01 : f32
    %27 = vector.broadcast %cst_21 : f32 to vector<8x32xf32>
    %28 = arith.addf %26, %27 : vector<8x32xf32>
    %29 = vector.extract_strided_slice %19 {offsets = [0, 64], sizes = [8, 32], strides = [1, 1]} : vector<8x128xf32> to vector<8x32xf32>
    %30 = math.tanh %29 : vector<8x32xf32>
    %cst_22 = arith.constant 5.000000e-01 : f32
    %31 = vector.broadcast %cst_22 : f32 to vector<8x32xf32>
    %32 = arith.mulf %31, %30 : vector<8x32xf32>
    %cst_23 = arith.constant 5.000000e-01 : f32
    %33 = vector.broadcast %cst_23 : f32 to vector<8x32xf32>
    %34 = arith.addf %32, %33 : vector<8x32xf32>
    %35 = vector.extract_strided_slice %19 {offsets = [0, 96], sizes = [8, 32], strides = [1, 1]} : vector<8x128xf32> to vector<8x32xf32>
    %36 = math.tanh %35 : vector<8x32xf32>
    %cst_24 = arith.constant 5.000000e-01 : f32
    %37 = vector.broadcast %cst_24 : f32 to vector<8x32xf32>
    %38 = arith.mulf %37, %36 : vector<8x32xf32>
    %cst_25 = arith.constant 5.000000e-01 : f32
    %39 = vector.broadcast %cst_25 : f32 to vector<8x32xf32>
    %40 = arith.addf %38, %39 : vector<8x32xf32>
    %41 = arith.mulf %34, %20 : vector<8x32xf32>
    %42 = arith.mulf %28, %22 : vector<8x32xf32>
    %43 = arith.addf %41, %42 : vector<8x32xf32>
    %44 = math.tanh %43 : vector<8x32xf32>
    %45 = arith.mulf %40, %44 : vector<8x32xf32>
    %c0_26 = arith.constant 0 : index
    %c0_27 = arith.constant 0 : index
    %46 = vector.load %arg9[%c0_26, %c0_27] : memref<8x32xf32, #tpu.memory_space<vmem>>, vector<8x32xf32>
    tpu.vector_store %arg9[%c0_26, %c0_27], %43 {strides = array<i32>} : memref<8x32xf32, #tpu.memory_space<vmem>>, vector<8x32xf32>,
    %c0_28 = arith.constant 0 : index
    %c0_29 = arith.constant 0 : index
    %47 = vector.load %arg8[%c0_28, %c0_29] : memref<8x32xf32, #tpu.memory_space<vmem>>, vector<8x32xf32>
    tpu.vector_store %arg8[%c0_28, %c0_29], %45 {strides = array<i32>} : memref<8x32xf32, #tpu.memory_space<vmem>>, vector<8x32xf32>,
    %48 = arith.truncf %45 : vector<8x32xf32> to vector<8x32xbf16>
    %49 = arith.index_cast %c0_i32_12 : i32 to index
    %c0_30 = arith.constant 0 : index
    %c0_31 = arith.constant 0 : index
    %50 = vector.load %arg6[%49, %c0_30, %c0_31] : memref<8x8x32xbf16, #tpu.memory_space<vmem>>, vector<1x8x32xbf16>
    %51 = vector.shape_cast %50 : vector<1x8x32xbf16> to vector<8x32xbf16>
    %52 = vector.shape_cast %48 : vector<8x32xbf16> to vector<1x8x32xbf16>
    tpu.vector_store %arg6[%49, %c0_30, %c0_31], %52 {strides = array<i32>} : memref<8x8x32xbf16, #tpu.memory_space<vmem>>, vector<1x8x32xbf16>,
    %c1_i32 = arith.constant 1 : i32
    %c0_32 = arith.constant 0 : index
    %c0_33 = arith.constant 0 : index
    %53 = vector.load %arg8[%c0_32, %c0_33] : memref<8x32xf32, #tpu.memory_space<vmem>>, vector<8x32xf32>
    %54 = arith.index_cast %c1_i32 : i32 to index
    %c0_34 = arith.constant 0 : index
    %c0_35 = arith.constant 0 : index
    %55 = vector.load %arg7[%54, %c0_34, %c0_35] : memref<8x8x128xf32, #tpu.memory_space<vmem>>, vector<1x8x128xf32>
    %56 = vector.shape_cast %55 : vector<1x8x128xf32> to vector<8x128xf32>
    %57 = arith.truncf %53 : vector<8x32xf32> to vector<8x32xbf16>
    %cst_36 = arith.constant dense<0.000000e+00> : vector<8x128xf32>
    %58 = tpu.matmul %57, %12, %cst_36 {dimension_numbers = #tpu.dot_dimension_numbers<[1], [0], [0], [1], [0, 0, 1, 1], [], []>} : vector<8x32xbf16>, vector<32x128xbf16>, vector<8x128xf32> -> vector<8x128xf32>
    %59 = arith.addf %56, %58 : vector<8x128xf32>
    %c0_37 = arith.constant 0 : index
    %c0_38 = arith.constant 0 : index
    %60 = vector.load %arg9[%c0_37, %c0_38] : memref<8x32xf32, #tpu.memory_space<vmem>>, vector<8x32xf32>
    %61 = vector.extract_strided_slice %59 {offsets = [0, 0], sizes = [8, 32], strides = [1, 1]} : vector<8x128xf32> to vector<8x32xf32>
    %62 = math.tanh %61 : vector<8x32xf32>
    %63 = vector.extract_strided_slice %59 {offsets = [0, 32], sizes = [8, 32], strides = [1, 1]} : vector<8x128xf32> to vector<8x32xf32>
    %64 = math.tanh %63 : vector<8x32xf32>
    %cst_39 = arith.constant 5.000000e-01 : f32
    %65 = vector.broadcast %cst_39 : f32 to vector<8x32xf32>
    %66 = arith.mulf %65, %64 : vector<8x32xf32>
    %cst_40 = arith.constant 5.000000e-01 : f32
    %67 = vector.broadcast %cst_40 : f32 to vector<8x32xf32>
    %68 = arith.addf %66, %67 : vector<8x32xf32>
    %69 = vector.extract_strided_slice %59 {offsets = [0, 64], sizes = [8, 32], strides = [1, 1]} : vector<8x128xf32> to vector<8x32xf32>
    %70 = math.tanh %69 : vector<8x32xf32>
    %cst_41 = arith.constant 5.000000e-01 : f32
    %71 = vector.broadcast %cst_41 : f32 to vector<8x32xf32>
    %72 = arith.mulf %71, %70 : vector<8x32xf32>
    %cst_42 = arith.constant 5.000000e-01 : f32
    %73 = vector.broadcast %cst_42 : f32 to vector<8x32xf32>
    %74 = arith.addf %72, %73 : vector<8x32xf32>
    %75 = vector.extract_strided_slice %59 {offsets = [0, 96], sizes = [8, 32], strides = [1, 1]} : vector<8x128xf32> to vector<8x32xf32>
    %76 = math.tanh %75 : vector<8x32xf32>
    %cst_43 = arith.constant 5.000000e-01 : f32
    %77 = vector.broadcast %cst_43 : f32 to vector<8x32xf32>
    %78 = arith.mulf %77, %76 : vector<8x32xf32>
    %cst_44 = arith.constant 5.000000e-01 : f32
    %79 = vector.broadcast %cst_44 : f32 to vector<8x32xf32>
    %80 = arith.addf %78, %79 : vector<8x32xf32>
    %81 = arith.mulf %74, %60 : vector<8x32xf32>
    %82 = arith.mulf %68, %62 : vector<8x32xf32>
    %83 = arith.addf %81, %82 : vector<8x32xf32>
    %84 = math.tanh %83 : vector<8x32xf32>
    %85 = arith.mulf %80, %84 : vector<8x32xf32>
    %c0_45 = arith.constant 0 : index
    %c0_46 = arith.constant 0 : index
    %86 = vector.load %arg9[%c0_45, %c0_46] : memref<8x32xf32, #tpu.memory_space<vmem>>, vector<8x32xf32>
    tpu.vector_store %arg9[%c0_45, %c0_46], %83 {strides = array<i32>} : memref<8x32xf32, #tpu.memory_space<vmem>>, vector<8x32xf32>,
    %c0_47 = arith.constant 0 : index
    %c0_48 = arith.constant 0 : index
    %87 = vector.load %arg8[%c0_47, %c0_48] : memref<8x32xf32, #tpu.memory_space<vmem>>, vector<8x32xf32>
    tpu.vector_store %arg8[%c0_47, %c0_48], %85 {strides = array<i32>} : memref<8x32xf32, #tpu.memory_space<vmem>>, vector<8x32xf32>,
    %88 = arith.truncf %85 : vector<8x32xf32> to vector<8x32xbf16>
    %89 = arith.index_cast %c1_i32 : i32 to index
    %c0_49 = arith.constant 0 : index
    %c0_50 = arith.constant 0 : index
    %90 = vector.load %arg6[%89, %c0_49, %c0_50] : memref<8x8x32xbf16, #tpu.memory_space<vmem>>, vector<1x8x32xbf16>
    %91 = vector.shape_cast %90 : vector<1x8x32xbf16> to vector<8x32xbf16>
    %92 = vector.shape_cast %88 : vector<8x32xbf16> to vector<1x8x32xbf16>
    tpu.vector_store %arg6[%89, %c0_49, %c0_50], %92 {strides = array<i32>} : memref<8x8x32xbf16, #tpu.memory_space<vmem>>, vector<1x8x32xbf16>,
    %c2_i32 = arith.constant 2 : i32
    %c0_51 = arith.constant 0 : index
    %c0_52 = arith.constant 0 : index
    %93 = vector.load %arg8[%c0_51, %c0_52] : memref<8x32xf32, #tpu.memory_space<vmem>>, vector<8x32xf32>
    %94 = arith.index_cast %c2_i32 : i32 to index
    %c0_53 = arith.constant 0 : index
    %c0_54 = arith.constant 0 : index
    %95 = vector.load %arg7[%94, %c0_53, %c0_54] : memref<8x8x128xf32, #tpu.memory_space<vmem>>, vector<1x8x128xf32>
    %96 = vector.shape_cast %95 : vector<1x8x128xf32> to vector<8x128xf32>
    %97 = arith.truncf %93 : vector<8x32xf32> to vector<8x32xbf16>
    %cst_55 = arith.constant dense<0.000000e+00> : vector<8x128xf32>
    %98 = tpu.matmul %97, %12, %cst_55 {dimension_numbers = #tpu.dot_dimension_numbers<[1], [0], [0], [1], [0, 0, 1, 1], [], []>} : vector<8x32xbf16>, vector<32x128xbf16>, vector<8x128xf32> -> vector<8x128xf32>
    %99 = arith.addf %96, %98 : vector<8x128xf32>
    %c0_56 = arith.constant 0 : index
    %c0_57 = arith.constant 0 : index
    %100 = vector.load %arg9[%c0_56, %c0_57] : memref<8x32xf32, #tpu.memory_space<vmem>>, vector<8x32xf32>
    %101 = vector.extract_strided_slice %99 {offsets = [0, 0], sizes = [8, 32], strides = [1, 1]} : vector<8x128xf32> to vector<8x32xf32>
    %102 = math.tanh %101 : vector<8x32xf32>
    %103 = vector.extract_strided_slice %99 {offsets = [0, 32], sizes = [8, 32], strides = [1, 1]} : vector<8x128xf32> to vector<8x32xf32>
    %104 = math.tanh %103 : vector<8x32xf32>
    %cst_58 = arith.constant 5.000000e-01 : f32
    %105 = vector.broadcast %cst_58 : f32 to vector<8x32xf32>
    %106 = arith.mulf %105, %104 : vector<8x32xf32>
    %cst_59 = arith.constant 5.000000e-01 : f32
    %107 = vector.broadcast %cst_59 : f32 to vector<8x32xf32>
    %108 = arith.addf %106, %107 : vector<8x32xf32>
    %109 = vector.extract_strided_slice %99 {offsets = [0, 64], sizes = [8, 32], strides = [1, 1]} : vector<8x128xf32> to vector<8x32xf32>
    %110 = math.tanh %109 : vector<8x32xf32>
    %cst_60 = arith.constant 5.000000e-01 : f32
    %111 = vector.broadcast %cst_60 : f32 to vector<8x32xf32>
    %112 = arith.mulf %111, %110 : vector<8x32xf32>
    %cst_61 = arith.constant 5.000000e-01 : f32
    %113 = vector.broadcast %cst_61 : f32 to vector<8x32xf32>
    %114 = arith.addf %112, %113 : vector<8x32xf32>
    %115 = vector.extract_strided_slice %99 {offsets = [0, 96], sizes = [8, 32], strides = [1, 1]} : vector<8x128xf32> to vector<8x32xf32>
    %116 = math.tanh %115 : vector<8x32xf32>
    %cst_62 = arith.constant 5.000000e-01 : f32
    %117 = vector.broadcast %cst_62 : f32 to vector<8x32xf32>
    %118 = arith.mulf %117, %116 : vector<8x32xf32>
    %cst_63 = arith.constant 5.000000e-01 : f32
    %119 = vector.broadcast %cst_63 : f32 to vector<8x32xf32>
    %120 = arith.addf %118, %119 : vector<8x32xf32>
    %121 = arith.mulf %114, %100 : vector<8x32xf32>
    %122 = arith.mulf %108, %102 : vector<8x32xf32>
    %123 = arith.addf %121, %122 : vector<8x32xf32>
    %124 = math.tanh %123 : vector<8x32xf32>
    %125 = arith.mulf %120, %124 : vector<8x32xf32>
    %c0_64 = arith.constant 0 : index
    %c0_65 = arith.constant 0 : index
    %126 = vector.load %arg9[%c0_64, %c0_65] : memref<8x32xf32, #tpu.memory_space<vmem>>, vector<8x32xf32>
    tpu.vector_store %arg9[%c0_64, %c0_65], %123 {strides = array<i32>} : memref<8x32xf32, #tpu.memory_space<vmem>>, vector<8x32xf32>,
    %c0_66 = arith.constant 0 : index
    %c0_67 = arith.constant 0 : index
    %127 = vector.load %arg8[%c0_66, %c0_67] : memref<8x32xf32, #tpu.memory_space<vmem>>, vector<8x32xf32>
    tpu.vector_store %arg8[%c0_66, %c0_67], %125 {strides = array<i32>} : memref<8x32xf32, #tpu.memory_space<vmem>>, vector<8x32xf32>,
    %128 = arith.truncf %125 : vector<8x32xf32> to vector<8x32xbf16>
    %129 = arith.index_cast %c2_i32 : i32 to index
    %c0_68 = arith.constant 0 : index
    %c0_69 = arith.constant 0 : index
    %130 = vector.load %arg6[%129, %c0_68, %c0_69] : memref<8x8x32xbf16, #tpu.memory_space<vmem>>, vector<1x8x32xbf16>
    %131 = vector.shape_cast %130 : vector<1x8x32xbf16> to vector<8x32xbf16>
    %132 = vector.shape_cast %128 : vector<8x32xbf16> to vector<1x8x32xbf16>
    tpu.vector_store %arg6[%129, %c0_68, %c0_69], %132 {strides = array<i32>} : memref<8x8x32xbf16, #tpu.memory_space<vmem>>, vector<1x8x32xbf16>,
    %c3_i32 = arith.constant 3 : i32
    %c0_70 = arith.constant 0 : index
    %c0_71 = arith.constant 0 : index
    %133 = vector.load %arg8[%c0_70, %c0_71] : memref<8x32xf32, #tpu.memory_space<vmem>>, vector<8x32xf32>
    %134 = arith.index_cast %c3_i32 : i32 to index
    %c0_72 = arith.constant 0 : index
    %c0_73 = arith.constant 0 : index
    %135 = vector.load %arg7[%134, %c0_72, %c0_73] : memref<8x8x128xf32, #tpu.memory_space<vmem>>, vector<1x8x128xf32>
    %136 = vector.shape_cast %135 : vector<1x8x128xf32> to vector<8x128xf32>
    %137 = arith.truncf %133 : vector<8x32xf32> to vector<8x32xbf16>
    %cst_74 = arith.constant dense<0.000000e+00> : vector<8x128xf32>
    %138 = tpu.matmul %137, %12, %cst_74 {dimension_numbers = #tpu.dot_dimension_numbers<[1], [0], [0], [1], [0, 0, 1, 1], [], []>} : vector<8x32xbf16>, vector<32x128xbf16>, vector<8x128xf32> -> vector<8x128xf32>
    %139 = arith.addf %136, %138 : vector<8x128xf32>
    %c0_75 = arith.constant 0 : index
    %c0_76 = arith.constant 0 : index
    %140 = vector.load %arg9[%c0_75, %c0_76] : memref<8x32xf32, #tpu.memory_space<vmem>>, vector<8x32xf32>
    %141 = vector.extract_strided_slice %139 {offsets = [0, 0], sizes = [8, 32], strides = [1, 1]} : vector<8x128xf32> to vector<8x32xf32>
    %142 = math.tanh %141 : vector<8x32xf32>
    %143 = vector.extract_strided_slice %139 {offsets = [0, 32], sizes = [8, 32], strides = [1, 1]} : vector<8x128xf32> to vector<8x32xf32>
    %144 = math.tanh %143 : vector<8x32xf32>
    %cst_77 = arith.constant 5.000000e-01 : f32
    %145 = vector.broadcast %cst_77 : f32 to vector<8x32xf32>
    %146 = arith.mulf %145, %144 : vector<8x32xf32>
    %cst_78 = arith.constant 5.000000e-01 : f32
    %147 = vector.broadcast %cst_78 : f32 to vector<8x32xf32>
    %148 = arith.addf %146, %147 : vector<8x32xf32>
    %149 = vector.extract_strided_slice %139 {offsets = [0, 64], sizes = [8, 32], strides = [1, 1]} : vector<8x128xf32> to vector<8x32xf32>
    %150 = math.tanh %149 : vector<8x32xf32>
    %cst_79 = arith.constant 5.000000e-01 : f32
    %151 = vector.broadcast %cst_79 : f32 to vector<8x32xf32>
    %152 = arith.mulf %151, %150 : vector<8x32xf32>
    %cst_80 = arith.constant 5.000000e-01 : f32
    %153 = vector.broadcast %cst_80 : f32 to vector<8x32xf32>
    %154 = arith.addf %152, %153 : vector<8x32xf32>
    %155 = vector.extract_strided_slice %139 {offsets = [0, 96], sizes = [8, 32], strides = [1, 1]} : vector<8x128xf32> to vector<8x32xf32>
    %156 = math.tanh %155 : vector<8x32xf32>
    %cst_81 = arith.constant 5.000000e-01 : f32
    %157 = vector.broadcast %cst_81 : f32 to vector<8x32xf32>
    %158 = arith.mulf %157, %156 : vector<8x32xf32>
    %cst_82 = arith.constant 5.000000e-01 : f32
    %159 = vector.broadcast %cst_82 : f32 to vector<8x32xf32>
    %160 = arith.addf %158, %159 : vector<8x32xf32>
    %161 = arith.mulf %154, %140 : vector<8x32xf32>
    %162 = arith.mulf %148, %142 : vector<8x32xf32>
    %163 = arith.addf %161, %162 : vector<8x32xf32>
    %164 = math.tanh %163 : vector<8x32xf32>
    %165 = arith.mulf %160, %164 : vector<8x32xf32>
    %c0_83 = arith.constant 0 : index
    %c0_84 = arith.constant 0 : index
    %166 = vector.load %arg9[%c0_83, %c0_84] : memref<8x32xf32, #tpu.memory_space<vmem>>, vector<8x32xf32>
    tpu.vector_store %arg9[%c0_83, %c0_84], %163 {strides = array<i32>} : memref<8x32xf32, #tpu.memory_space<vmem>>, vector<8x32xf32>,
    %c0_85 = arith.constant 0 : index
    %c0_86 = arith.constant 0 : index
    %167 = vector.load %arg8[%c0_85, %c0_86] : memref<8x32xf32, #tpu.memory_space<vmem>>, vector<8x32xf32>
    tpu.vector_store %arg8[%c0_85, %c0_86], %165 {strides = array<i32>} : memref<8x32xf32, #tpu.memory_space<vmem>>, vector<8x32xf32>,
    %168 = arith.truncf %165 : vector<8x32xf32> to vector<8x32xbf16>
    %169 = arith.index_cast %c3_i32 : i32 to index
    %c0_87 = arith.constant 0 : index
    %c0_88 = arith.constant 0 : index
    %170 = vector.load %arg6[%169, %c0_87, %c0_88] : memref<8x8x32xbf16, #tpu.memory_space<vmem>>, vector<1x8x32xbf16>
    %171 = vector.shape_cast %170 : vector<1x8x32xbf16> to vector<8x32xbf16>
    %172 = vector.shape_cast %168 : vector<8x32xbf16> to vector<1x8x32xbf16>
    tpu.vector_store %arg6[%169, %c0_87, %c0_88], %172 {strides = array<i32>} : memref<8x8x32xbf16, #tpu.memory_space<vmem>>, vector<1x8x32xbf16>,
    %c4_i32 = arith.constant 4 : i32
    %c0_89 = arith.constant 0 : index
    %c0_90 = arith.constant 0 : index
    %173 = vector.load %arg8[%c0_89, %c0_90] : memref<8x32xf32, #tpu.memory_space<vmem>>, vector<8x32xf32>
    %174 = arith.index_cast %c4_i32 : i32 to index
    %c0_91 = arith.constant 0 : index
    %c0_92 = arith.constant 0 : index
    %175 = vector.load %arg7[%174, %c0_91, %c0_92] : memref<8x8x128xf32, #tpu.memory_space<vmem>>, vector<1x8x128xf32>
    %176 = vector.shape_cast %175 : vector<1x8x128xf32> to vector<8x128xf32>
    %177 = arith.truncf %173 : vector<8x32xf32> to vector<8x32xbf16>
    %cst_93 = arith.constant dense<0.000000e+00> : vector<8x128xf32>
    %178 = tpu.matmul %177, %12, %cst_93 {dimension_numbers = #tpu.dot_dimension_numbers<[1], [0], [0], [1], [0, 0, 1, 1], [], []>} : vector<8x32xbf16>, vector<32x128xbf16>, vector<8x128xf32> -> vector<8x128xf32>
    %179 = arith.addf %176, %178 : vector<8x128xf32>
    %c0_94 = arith.constant 0 : index
    %c0_95 = arith.constant 0 : index
    %180 = vector.load %arg9[%c0_94, %c0_95] : memref<8x32xf32, #tpu.memory_space<vmem>>, vector<8x32xf32>
    %181 = vector.extract_strided_slice %179 {offsets = [0, 0], sizes = [8, 32], strides = [1, 1]} : vector<8x128xf32> to vector<8x32xf32>
    %182 = math.tanh %181 : vector<8x32xf32>
    %183 = vector.extract_strided_slice %179 {offsets = [0, 32], sizes = [8, 32], strides = [1, 1]} : vector<8x128xf32> to vector<8x32xf32>
    %184 = math.tanh %183 : vector<8x32xf32>
    %cst_96 = arith.constant 5.000000e-01 : f32
    %185 = vector.broadcast %cst_96 : f32 to vector<8x32xf32>
    %186 = arith.mulf %185, %184 : vector<8x32xf32>
    %cst_97 = arith.constant 5.000000e-01 : f32
    %187 = vector.broadcast %cst_97 : f32 to vector<8x32xf32>
    %188 = arith.addf %186, %187 : vector<8x32xf32>
    %189 = vector.extract_strided_slice %179 {offsets = [0, 64], sizes = [8, 32], strides = [1, 1]} : vector<8x128xf32> to vector<8x32xf32>
    %190 = math.tanh %189 : vector<8x32xf32>
    %cst_98 = arith.constant 5.000000e-01 : f32
    %191 = vector.broadcast %cst_98 : f32 to vector<8x32xf32>
    %192 = arith.mulf %191, %190 : vector<8x32xf32>
    %cst_99 = arith.constant 5.000000e-01 : f32
    %193 = vector.broadcast %cst_99 : f32 to vector<8x32xf32>
    %194 = arith.addf %192, %193 : vector<8x32xf32>
    %195 = vector.extract_strided_slice %179 {offsets = [0, 96], sizes = [8, 32], strides = [1, 1]} : vector<8x128xf32> to vector<8x32xf32>
    %196 = math.tanh %195 : vector<8x32xf32>
    %cst_100 = arith.constant 5.000000e-01 : f32
    %197 = vector.broadcast %cst_100 : f32 to vector<8x32xf32>
    %198 = arith.mulf %197, %196 : vector<8x32xf32>
    %cst_101 = arith.constant 5.000000e-01 : f32
    %199 = vector.broadcast %cst_101 : f32 to vector<8x32xf32>
    %200 = arith.addf %198, %199 : vector<8x32xf32>
    %201 = arith.mulf %194, %180 : vector<8x32xf32>
    %202 = arith.mulf %188, %182 : vector<8x32xf32>
    %203 = arith.addf %201, %202 : vector<8x32xf32>
    %204 = math.tanh %203 : vector<8x32xf32>
    %205 = arith.mulf %200, %204 : vector<8x32xf32>
    %c0_102 = arith.constant 0 : index
    %c0_103 = arith.constant 0 : index
    %206 = vector.load %arg9[%c0_102, %c0_103] : memref<8x32xf32, #tpu.memory_space<vmem>>, vector<8x32xf32>
    tpu.vector_store %arg9[%c0_102, %c0_103], %203 {strides = array<i32>} : memref<8x32xf32, #tpu.memory_space<vmem>>, vector<8x32xf32>,
    %c0_104 = arith.constant 0 : index
    %c0_105 = arith.constant 0 : index
    %207 = vector.load %arg8[%c0_104, %c0_105] : memref<8x32xf32, #tpu.memory_space<vmem>>, vector<8x32xf32>
    tpu.vector_store %arg8[%c0_104, %c0_105], %205 {strides = array<i32>} : memref<8x32xf32, #tpu.memory_space<vmem>>, vector<8x32xf32>,
    %208 = arith.truncf %205 : vector<8x32xf32> to vector<8x32xbf16>
    %209 = arith.index_cast %c4_i32 : i32 to index
    %c0_106 = arith.constant 0 : index
    %c0_107 = arith.constant 0 : index
    %210 = vector.load %arg6[%209, %c0_106, %c0_107] : memref<8x8x32xbf16, #tpu.memory_space<vmem>>, vector<1x8x32xbf16>
    %211 = vector.shape_cast %210 : vector<1x8x32xbf16> to vector<8x32xbf16>
    %212 = vector.shape_cast %208 : vector<8x32xbf16> to vector<1x8x32xbf16>
    tpu.vector_store %arg6[%209, %c0_106, %c0_107], %212 {strides = array<i32>} : memref<8x8x32xbf16, #tpu.memory_space<vmem>>, vector<1x8x32xbf16>,
    %c5_i32 = arith.constant 5 : i32
    %c0_108 = arith.constant 0 : index
    %c0_109 = arith.constant 0 : index
    %213 = vector.load %arg8[%c0_108, %c0_109] : memref<8x32xf32, #tpu.memory_space<vmem>>, vector<8x32xf32>
    %214 = arith.index_cast %c5_i32 : i32 to index
    %c0_110 = arith.constant 0 : index
    %c0_111 = arith.constant 0 : index
    %215 = vector.load %arg7[%214, %c0_110, %c0_111] : memref<8x8x128xf32, #tpu.memory_space<vmem>>, vector<1x8x128xf32>
    %216 = vector.shape_cast %215 : vector<1x8x128xf32> to vector<8x128xf32>
    %217 = arith.truncf %213 : vector<8x32xf32> to vector<8x32xbf16>
    %cst_112 = arith.constant dense<0.000000e+00> : vector<8x128xf32>
    %218 = tpu.matmul %217, %12, %cst_112 {dimension_numbers = #tpu.dot_dimension_numbers<[1], [0], [0], [1], [0, 0, 1, 1], [], []>} : vector<8x32xbf16>, vector<32x128xbf16>, vector<8x128xf32> -> vector<8x128xf32>
    %219 = arith.addf %216, %218 : vector<8x128xf32>
    %c0_113 = arith.constant 0 : index
    %c0_114 = arith.constant 0 : index
    %220 = vector.load %arg9[%c0_113, %c0_114] : memref<8x32xf32, #tpu.memory_space<vmem>>, vector<8x32xf32>
    %221 = vector.extract_strided_slice %219 {offsets = [0, 0], sizes = [8, 32], strides = [1, 1]} : vector<8x128xf32> to vector<8x32xf32>
    %222 = math.tanh %221 : vector<8x32xf32>
    %223 = vector.extract_strided_slice %219 {offsets = [0, 32], sizes = [8, 32], strides = [1, 1]} : vector<8x128xf32> to vector<8x32xf32>
    %224 = math.tanh %223 : vector<8x32xf32>
    %cst_115 = arith.constant 5.000000e-01 : f32
    %225 = vector.broadcast %cst_115 : f32 to vector<8x32xf32>
    %226 = arith.mulf %225, %224 : vector<8x32xf32>
    %cst_116 = arith.constant 5.000000e-01 : f32
    %227 = vector.broadcast %cst_116 : f32 to vector<8x32xf32>
    %228 = arith.addf %226, %227 : vector<8x32xf32>
    %229 = vector.extract_strided_slice %219 {offsets = [0, 64], sizes = [8, 32], strides = [1, 1]} : vector<8x128xf32> to vector<8x32xf32>
    %230 = math.tanh %229 : vector<8x32xf32>
    %cst_117 = arith.constant 5.000000e-01 : f32
    %231 = vector.broadcast %cst_117 : f32 to vector<8x32xf32>
    %232 = arith.mulf %231, %230 : vector<8x32xf32>
    %cst_118 = arith.constant 5.000000e-01 : f32
    %233 = vector.broadcast %cst_118 : f32 to vector<8x32xf32>
    %234 = arith.addf %232, %233 : vector<8x32xf32>
    %235 = vector.extract_strided_slice %219 {offsets = [0, 96], sizes = [8, 32], strides = [1, 1]} : vector<8x128xf32> to vector<8x32xf32>
    %236 = math.tanh %235 : vector<8x32xf32>
    %cst_119 = arith.constant 5.000000e-01 : f32
    %237 = vector.broadcast %cst_119 : f32 to vector<8x32xf32>
    %238 = arith.mulf %237, %236 : vector<8x32xf32>
    %cst_120 = arith.constant 5.000000e-01 : f32
    %239 = vector.broadcast %cst_120 : f32 to vector<8x32xf32>
    %240 = arith.addf %238, %239 : vector<8x32xf32>
    %241 = arith.mulf %234, %220 : vector<8x32xf32>
    %242 = arith.mulf %228, %222 : vector<8x32xf32>
    %243 = arith.addf %241, %242 : vector<8x32xf32>
    %244 = math.tanh %243 : vector<8x32xf32>
    %245 = arith.mulf %240, %244 : vector<8x32xf32>
    %c0_121 = arith.constant 0 : index
    %c0_122 = arith.constant 0 : index
    %246 = vector.load %arg9[%c0_121, %c0_122] : memref<8x32xf32, #tpu.memory_space<vmem>>, vector<8x32xf32>
    tpu.vector_store %arg9[%c0_121, %c0_122], %243 {strides = array<i32>} : memref<8x32xf32, #tpu.memory_space<vmem>>, vector<8x32xf32>,
    %c0_123 = arith.constant 0 : index
    %c0_124 = arith.constant 0 : index
    %247 = vector.load %arg8[%c0_123, %c0_124] : memref<8x32xf32, #tpu.memory_space<vmem>>, vector<8x32xf32>
    tpu.vector_store %arg8[%c0_123, %c0_124], %245 {strides = array<i32>} : memref<8x32xf32, #tpu.memory_space<vmem>>, vector<8x32xf32>,
    %248 = arith.truncf %245 : vector<8x32xf32> to vector<8x32xbf16>
    %249 = arith.index_cast %c5_i32 : i32 to index
    %c0_125 = arith.constant 0 : index
    %c0_126 = arith.constant 0 : index
    %250 = vector.load %arg6[%249, %c0_125, %c0_126] : memref<8x8x32xbf16, #tpu.memory_space<vmem>>, vector<1x8x32xbf16>
    %251 = vector.shape_cast %250 : vector<1x8x32xbf16> to vector<8x32xbf16>
    %252 = vector.shape_cast %248 : vector<8x32xbf16> to vector<1x8x32xbf16>
    tpu.vector_store %arg6[%249, %c0_125, %c0_126], %252 {strides = array<i32>} : memref<8x8x32xbf16, #tpu.memory_space<vmem>>, vector<1x8x32xbf16>,
    %c6_i32 = arith.constant 6 : i32
    %c0_127 = arith.constant 0 : index
    %c0_128 = arith.constant 0 : index
    %253 = vector.load %arg8[%c0_127, %c0_128] : memref<8x32xf32, #tpu.memory_space<vmem>>, vector<8x32xf32>
    %254 = arith.index_cast %c6_i32 : i32 to index
    %c0_129 = arith.constant 0 : index
    %c0_130 = arith.constant 0 : index
    %255 = vector.load %arg7[%254, %c0_129, %c0_130] : memref<8x8x128xf32, #tpu.memory_space<vmem>>, vector<1x8x128xf32>
    %256 = vector.shape_cast %255 : vector<1x8x128xf32> to vector<8x128xf32>
    %257 = arith.truncf %253 : vector<8x32xf32> to vector<8x32xbf16>
    %cst_131 = arith.constant dense<0.000000e+00> : vector<8x128xf32>
    %258 = tpu.matmul %257, %12, %cst_131 {dimension_numbers = #tpu.dot_dimension_numbers<[1], [0], [0], [1], [0, 0, 1, 1], [], []>} : vector<8x32xbf16>, vector<32x128xbf16>, vector<8x128xf32> -> vector<8x128xf32>
    %259 = arith.addf %256, %258 : vector<8x128xf32>
    %c0_132 = arith.constant 0 : index
    %c0_133 = arith.constant 0 : index
    %260 = vector.load %arg9[%c0_132, %c0_133] : memref<8x32xf32, #tpu.memory_space<vmem>>, vector<8x32xf32>
    %261 = vector.extract_strided_slice %259 {offsets = [0, 0], sizes = [8, 32], strides = [1, 1]} : vector<8x128xf32> to vector<8x32xf32>
    %262 = math.tanh %261 : vector<8x32xf32>
    %263 = vector.extract_strided_slice %259 {offsets = [0, 32], sizes = [8, 32], strides = [1, 1]} : vector<8x128xf32> to vector<8x32xf32>
    %264 = math.tanh %263 : vector<8x32xf32>
    %cst_134 = arith.constant 5.000000e-01 : f32
    %265 = vector.broadcast %cst_134 : f32 to vector<8x32xf32>
    %266 = arith.mulf %265, %264 : vector<8x32xf32>
    %cst_135 = arith.constant 5.000000e-01 : f32
    %267 = vector.broadcast %cst_135 : f32 to vector<8x32xf32>
    %268 = arith.addf %266, %267 : vector<8x32xf32>
    %269 = vector.extract_strided_slice %259 {offsets = [0, 64], sizes = [8, 32], strides = [1, 1]} : vector<8x128xf32> to vector<8x32xf32>
    %270 = math.tanh %269 : vector<8x32xf32>
    %cst_136 = arith.constant 5.000000e-01 : f32
    %271 = vector.broadcast %cst_136 : f32 to vector<8x32xf32>
    %272 = arith.mulf %271, %270 : vector<8x32xf32>
    %cst_137 = arith.constant 5.000000e-01 : f32
    %273 = vector.broadcast %cst_137 : f32 to vector<8x32xf32>
    %274 = arith.addf %272, %273 : vector<8x32xf32>
    %275 = vector.extract_strided_slice %259 {offsets = [0, 96], sizes = [8, 32], strides = [1, 1]} : vector<8x128xf32> to vector<8x32xf32>
    %276 = math.tanh %275 : vector<8x32xf32>
    %cst_138 = arith.constant 5.000000e-01 : f32
    %277 = vector.broadcast %cst_138 : f32 to vector<8x32xf32>
    %278 = arith.mulf %277, %276 : vector<8x32xf32>
    %cst_139 = arith.constant 5.000000e-01 : f32
    %279 = vector.broadcast %cst_139 : f32 to vector<8x32xf32>
    %280 = arith.addf %278, %279 : vector<8x32xf32>
    %281 = arith.mulf %274, %260 : vector<8x32xf32>
    %282 = arith.mulf %268, %262 : vector<8x32xf32>
    %283 = arith.addf %281, %282 : vector<8x32xf32>
    %284 = math.tanh %283 : vector<8x32xf32>
    %285 = arith.mulf %280, %284 : vector<8x32xf32>
    %c0_140 = arith.constant 0 : index
    %c0_141 = arith.constant 0 : index
    %286 = vector.load %arg9[%c0_140, %c0_141] : memref<8x32xf32, #tpu.memory_space<vmem>>, vector<8x32xf32>
    tpu.vector_store %arg9[%c0_140, %c0_141], %283 {strides = array<i32>} : memref<8x32xf32, #tpu.memory_space<vmem>>, vector<8x32xf32>,
    %c0_142 = arith.constant 0 : index
    %c0_143 = arith.constant 0 : index
    %287 = vector.load %arg8[%c0_142, %c0_143] : memref<8x32xf32, #tpu.memory_space<vmem>>, vector<8x32xf32>
    tpu.vector_store %arg8[%c0_142, %c0_143], %285 {strides = array<i32>} : memref<8x32xf32, #tpu.memory_space<vmem>>, vector<8x32xf32>,
    %288 = arith.truncf %285 : vector<8x32xf32> to vector<8x32xbf16>
    %289 = arith.index_cast %c6_i32 : i32 to index
    %c0_144 = arith.constant 0 : index
    %c0_145 = arith.constant 0 : index
    %290 = vector.load %arg6[%289, %c0_144, %c0_145] : memref<8x8x32xbf16, #tpu.memory_space<vmem>>, vector<1x8x32xbf16>
    %291 = vector.shape_cast %290 : vector<1x8x32xbf16> to vector<8x32xbf16>
    %292 = vector.shape_cast %288 : vector<8x32xbf16> to vector<1x8x32xbf16>
    tpu.vector_store %arg6[%289, %c0_144, %c0_145], %292 {strides = array<i32>} : memref<8x8x32xbf16, #tpu.memory_space<vmem>>, vector<1x8x32xbf16>,
    %c7_i32 = arith.constant 7 : i32
    %c0_146 = arith.constant 0 : index
    %c0_147 = arith.constant 0 : index
    %293 = vector.load %arg8[%c0_146, %c0_147] : memref<8x32xf32, #tpu.memory_space<vmem>>, vector<8x32xf32>
    %294 = arith.index_cast %c7_i32 : i32 to index
    %c0_148 = arith.constant 0 : index
    %c0_149 = arith.constant 0 : index
    %295 = vector.load %arg7[%294, %c0_148, %c0_149] : memref<8x8x128xf32, #tpu.memory_space<vmem>>, vector<1x8x128xf32>
    %296 = vector.shape_cast %295 : vector<1x8x128xf32> to vector<8x128xf32>
    %297 = arith.truncf %293 : vector<8x32xf32> to vector<8x32xbf16>
    %cst_150 = arith.constant dense<0.000000e+00> : vector<8x128xf32>
    %298 = tpu.matmul %297, %12, %cst_150 {dimension_numbers = #tpu.dot_dimension_numbers<[1], [0], [0], [1], [0, 0, 1, 1], [], []>} : vector<8x32xbf16>, vector<32x128xbf16>, vector<8x128xf32> -> vector<8x128xf32>
    %299 = arith.addf %296, %298 : vector<8x128xf32>
    %c0_151 = arith.constant 0 : index
    %c0_152 = arith.constant 0 : index
    %300 = vector.load %arg9[%c0_151, %c0_152] : memref<8x32xf32, #tpu.memory_space<vmem>>, vector<8x32xf32>
    %301 = vector.extract_strided_slice %299 {offsets = [0, 0], sizes = [8, 32], strides = [1, 1]} : vector<8x128xf32> to vector<8x32xf32>
    %302 = math.tanh %301 : vector<8x32xf32>
    %303 = vector.extract_strided_slice %299 {offsets = [0, 32], sizes = [8, 32], strides = [1, 1]} : vector<8x128xf32> to vector<8x32xf32>
    %304 = math.tanh %303 : vector<8x32xf32>
    %cst_153 = arith.constant 5.000000e-01 : f32
    %305 = vector.broadcast %cst_153 : f32 to vector<8x32xf32>
    %306 = arith.mulf %305, %304 : vector<8x32xf32>
    %cst_154 = arith.constant 5.000000e-01 : f32
    %307 = vector.broadcast %cst_154 : f32 to vector<8x32xf32>
    %308 = arith.addf %306, %307 : vector<8x32xf32>
    %309 = vector.extract_strided_slice %299 {offsets = [0, 64], sizes = [8, 32], strides = [1, 1]} : vector<8x128xf32> to vector<8x32xf32>
    %310 = math.tanh %309 : vector<8x32xf32>
    %cst_155 = arith.constant 5.000000e-01 : f32
    %311 = vector.broadcast %cst_155 : f32 to vector<8x32xf32>
    %312 = arith.mulf %311, %310 : vector<8x32xf32>
    %cst_156 = arith.constant 5.000000e-01 : f32
    %313 = vector.broadcast %cst_156 : f32 to vector<8x32xf32>
    %314 = arith.addf %312, %313 : vector<8x32xf32>
    %315 = vector.extract_strided_slice %299 {offsets = [0, 96], sizes = [8, 32], strides = [1, 1]} : vector<8x128xf32> to vector<8x32xf32>
    %316 = math.tanh %315 : vector<8x32xf32>
    %cst_157 = arith.constant 5.000000e-01 : f32
    %317 = vector.broadcast %cst_157 : f32 to vector<8x32xf32>
    %318 = arith.mulf %317, %316 : vector<8x32xf32>
    %cst_158 = arith.constant 5.000000e-01 : f32
    %319 = vector.broadcast %cst_158 : f32 to vector<8x32xf32>
    %320 = arith.addf %318, %319 : vector<8x32xf32>
    %321 = arith.mulf %314, %300 : vector<8x32xf32>
    %322 = arith.mulf %308, %302 : vector<8x32xf32>
    %323 = arith.addf %321, %322 : vector<8x32xf32>
    %324 = math.tanh %323 : vector<8x32xf32>
    %325 = arith.mulf %320, %324 : vector<8x32xf32>
    %c0_159 = arith.constant 0 : index
    %c0_160 = arith.constant 0 : index
    %326 = vector.load %arg9[%c0_159, %c0_160] : memref<8x32xf32, #tpu.memory_space<vmem>>, vector<8x32xf32>
    tpu.vector_store %arg9[%c0_159, %c0_160], %323 {strides = array<i32>} : memref<8x32xf32, #tpu.memory_space<vmem>>, vector<8x32xf32>,
    %c0_161 = arith.constant 0 : index
    %c0_162 = arith.constant 0 : index
    %327 = vector.load %arg8[%c0_161, %c0_162] : memref<8x32xf32, #tpu.memory_space<vmem>>, vector<8x32xf32>
    tpu.vector_store %arg8[%c0_161, %c0_162], %325 {strides = array<i32>} : memref<8x32xf32, #tpu.memory_space<vmem>>, vector<8x32xf32>,
    %328 = arith.truncf %325 : vector<8x32xf32> to vector<8x32xbf16>
    %329 = arith.index_cast %c7_i32 : i32 to index
    %c0_163 = arith.constant 0 : index
    %c0_164 = arith.constant 0 : index
    %330 = vector.load %arg6[%329, %c0_163, %c0_164] : memref<8x8x32xbf16, #tpu.memory_space<vmem>>, vector<1x8x32xbf16>
    %331 = vector.shape_cast %330 : vector<1x8x32xbf16> to vector<8x32xbf16>
    %332 = vector.shape_cast %328 : vector<8x32xbf16> to vector<1x8x32xbf16>
    tpu.vector_store %arg6[%329, %c0_163, %c0_164], %332 {strides = array<i32>} : memref<8x8x32xbf16, #tpu.memory_space<vmem>>, vector<1x8x32xbf16>,
    %c8_i32 = arith.constant 8 : i32
    return
  }
  func.func @transform_0(%arg0: i32, %arg1: i32) -> (i32, i32, i32) {
    %c0_i32 = arith.constant 0 : i32
    %c0_i32_0 = arith.constant 0 : i32
    return %arg1, %arg0, %c0_i32 : i32, i32, i32
  }
  func.func @transform_1(%arg0: i32, %arg1: i32) -> (i32, i32) {
    %c0_i32 = arith.constant 0 : i32
    %c0_i32_0 = arith.constant 0 : i32
    %c0_i32_1 = arith.constant 0 : i32
    return %c0_i32, %c0_i32_0 : i32, i32
  }
  func.func @transform_2(%arg0: i32, %arg1: i32) -> (i32, i32) {
    %c0_i32 = arith.constant 0 : i32
    %c0_i32_0 = arith.constant 0 : i32
    %c0_i32_1 = arith.constant 0 : i32
    return %c0_i32, %c0_i32_0 : i32, i32
  }
  func.func @transform_3(%arg0: i32, %arg1: i32) -> (i32, i32) {
    %c0_i32 = arith.constant 0 : i32
    %c0_i32_0 = arith.constant 0 : i32
    %c0_i32_1 = arith.constant 0 : i32
    return %c0_i32, %c0_i32_0 : i32, i32
  }
  func.func @transform_4(%arg0: i32, %arg1: i32) -> (i32, i32, i32) {
    %c0_i32 = arith.constant 0 : i32
    %c0_i32_0 = arith.constant 0 : i32
    return %arg1, %arg0, %c0_i32 : i32, i32, i32
  }
}

</mosaic_0001>

<bundles_post_ra>
// kernel: tpu_custom_call.1
= control target key start
LH: loop header
LB: loop body
LE: loop exit
PB: predicated region body
PF: predicated region fallthrough
CT: control target
= control target key end

     0   :  { %9 = vsyncpa [#allocation6], 0  ;;  %s1557_s0 = inlined_call_operand.hbm [shape: bf16[8,8,16], index: 0, kind: input, shape index: {}]   ;;  %s1558_s1 = inlined_call_operand.hbm [shape: bf16[16,128], index: 1, kind: input, shape index: {}]   ;;  %s1559_s2 = inlined_call_operand.vmem [shape: f32[1,128], index: 2, kind: input, shape index: {}]   ;;  %s1560_s3 = inlined_call_operand.hbm [shape: bf16[32,128], index: 3, kind: input, shape index: {}]   ;;  %s1561_s4 = inlined_call_operand.hbm [shape: bf16[8,8,32], index: 4, kind: output, shape index: {}]  }
   0x1   :  { %10 = vsyncpa [#allocation9], 0 }
   0x2   :  { %11 = vsyncpa [#allocation7], 0  ;;  %s1247_s15 = smov [#allocation8]   ;;  %s1248_s17 = smov [#allocation5]  }
   0x3   :  { %s29_s16 = sshll.u32 %s1247_s15, 4  ;;  %s17_s18 = sshll.u32 %s1248_s17, 4  ;;  %s30_s16 = int_to_ptr.vmem [resolvable:$true] %s29_s16  ;;  %s1281_s18 = int_to_ptr.vmem [resolvable:$true] %s17_s18 }
   0x4   :  { %s1153_s21 = scalar_lea.hbm %s1558_s1, 128 }
   0x5   :  { %p1154_p0 = scmp.ne.s32.totalorder %s1558_s1, %s1153_s21  ;;  %p1157_p1 = scmp.lt.u32.totalorder %s1153_s21, %s1558_s1 }
   0x7   :  { %p1159_p2 = pnand %p1157_p1, %p1154_p0 }
   0x9   :  { %1162 = shalt.err (!%p1159_p2)
}
   0xa   :  { %s1163_s26 = scalar_lea.vmem %s30_s16, 128  ;;  %p1168_p4 = scmp.lt.s32.totalorder %s30_s16, %s30_s16 }
   0xb   :  { %p1164_p3 = scmp.ne.s32.totalorder %s30_s16, %s1163_s26  ;;  %p1169_p5 = scmp.lt.s32.totalorder %s1163_s26, %s1163_s26 }
   0xd   :  { %p1170_p6 = por %p1169_p5, %p1168_p4 }
   0xf   :  { %p1171_p7 = pnand %p1170_p6, %p1164_p3 }
  0x11   :  { %1174 = shalt.err (!%p1171_p7)
}
  0x12   :  { %s1249_s27 = smov 64   ;;  %s1250_s28 = smov 4  }
  0x13   :  { %35 = dma.hbm_to_vmem [thread:$0]  %s1558_s1, 128, %s30_s16, [#allocation9], %s1249_s27, %s1249_s27, %s1250_s28  }
  0x14   :  { %s1175_s7 = scalar_lea.hbm %s1557_s0, 512 }
  0x15   :  { %p1176_p8 = scmp.ne.s32.totalorder %s1557_s0, %s1175_s7  ;;  %p1179_p9 = scmp.lt.u32.totalorder %s1175_s7, %s1557_s0 }
  0x17   :  { %p1181_p10 = pnand %p1179_p9, %p1176_p8 }
  0x19   :  { %1184 = shalt.err (!%p1181_p10)
}
  0x1a   :  { %s1185_s12 = scalar_lea.vmem %s1281_s18, 512  ;;  %p1190_p12 = scmp.lt.s32.totalorder %s1281_s18, %s1281_s18 }
  0x1b   :  { %p1186_p11 = scmp.ne.s32.totalorder %s1281_s18, %s1185_s12  ;;  %p1191_p13 = scmp.lt.s32.totalorder %s1185_s12, %s1185_s12 }
  0x1d   :  { %p1192_p0 = por %p1191_p13, %p1190_p12 }
  0x1f   :  { %p1193_p1 = pnand %p1192_p0, %p1186_p11 }
  0x21   :  { %1196 = shalt.err (!%p1193_p1)
}
  0x22   :  { %23 = dma.hbm_to_vmem [thread:$0]  %s1557_s0, 512, %s1281_s18, [#allocation6], %s1249_s27, %s1249_s27, %s1250_s28  }
  0x23   :  { %s1251_s14 = smov [#allocation10]   ;;  %s1197_s19 = scalar_lea.hbm %s1560_s3, 256 }
  0x24   :  { %s43_s15 = sshll.u32 %s1251_s14, 4  ;;  %p1198_p2 = scmp.ne.s32.totalorder %s1560_s3, %s1197_s19  ;;  %s44_s15 = int_to_ptr.vmem [resolvable:$true] %s43_s15 }
  0x25   :  { %p1201_p3 = scmp.lt.u32.totalorder %s1197_s19, %s1560_s3 }
  0x27   :  { %p1203_p4 = pnand %p1201_p3, %p1198_p2 }
  0x29   :  { %1206 = shalt.err (!%p1203_p4)
}
  0x2a   :  { %s1207_s24 = scalar_lea.vmem %s44_s15, 256  ;;  %p1212_p6 = scmp.lt.s32.totalorder %s44_s15, %s44_s15 }
  0x2b   :  { %p1208_p5 = scmp.ne.s32.totalorder %s44_s15, %s1207_s24  ;;  %p1213_p7 = scmp.lt.s32.totalorder %s1207_s24, %s1207_s24 }
  0x2d   :  { %p1214_p8 = por %p1213_p7, %p1212_p6 }
  0x2f   :  { %p1215_p9 = pnand %p1214_p8, %p1208_p5 }
  0x31   :  { %1218 = shalt.err (!%p1215_p9)
}
  0x32   :  { %49 = dma.hbm_to_vmem [thread:$0]  %s1560_s3, 256, %s44_s15, [#allocation9], %s1249_s27, %s1249_s27, %s1250_s28  }
  0x33   :  { %1241 = dma.done.wait [#allocation6], 512  }
  0x34   :  { %1242 = vsyncadd [#allocation6], 4294966784 }
  0x35   :  { %1243 = dma.done.wait [#allocation9], 384  }
  0x36   :  { %1244 = vsyncadd [#allocation9], 4294966912  ;;  %vm64_vm0 = vcmask 261120   ;;  %v1252_v0 = vmov 0.0   ;;  %vm1253_vm1 = vmmov 0   ;;  %v1114_v1 = vld [vmem:[#allocation8] sm:$0xff]  }
  0x37   :  { %1041 = vmatprep.subr.bf16.mxu1 %v1252_v0  ;;  %1045 = vmatprep.mubr.msk.bf16.mxu1 %vm1253_vm1, %v1252_v0  ;;  %65 = vst.msk [vmem:[#allocation3] sm:$0xff] %vm64_vm0, %v1252_v0  ;;  %66 = vst.msk [vmem:[#allocation4] sm:$0xff] %vm64_vm0, %v1252_v0  ;;  %v1340_v2 = vld [vmem:[#allocation10] sm:$0xff]   ;;  %vm110_vm2 = vcmask 130048   ;;  %v1116_v3 = vld [vmem:[#allocation5] sm:$0xff]   ;;  %s1254_s26 = smov 32  }
  0x38   :  { %1031 = vmatprep.subr.bf16.mxu0 %v1114_v1  ;;  %1042 = vmatpush3.bf16.msra.mxu1 %v1340_v2  ;;  %v1117_v4 = vld [vmem:[#allocation5 + $0x8] sm:$0xff]   ;;  %v1345_v5 = vld [vmem:[#allocation10 + $0x8] sm:$0xff]   ;;  %v1120_v54 = vld [vmem:[#allocation5 + $0x18] sm:$0xff]   ;;  %vm302_vm3 = vcmask 257024  }
  0x39   :  { %1032 = vmatpush3.bf16.msra.mxu0 %v1114_v1  ;;  %1033 = vmatprep.mubr.msk.bf16.mxu0 %vm110_vm2, %v1116_v3  ;;  %v1365_v8 = vld [vmem:[%s1559_s2] ss:$0 sm:$0xff]  ;;  %s1255_s2 = smov [#allocation11]  }
  0x3a   :  { %1043 = vmatprep.subr.bf16.mxu1 %v1252_v0  ;;  %1057 = vmatprep.subr.bf16.mxu0 %v1252_v0  ;;  %v1119_v53 = vld [vmem:[#allocation5 + $0x10] sm:$0xff]   ;;  %s953_s29 = sshll.u32 %s1255_s2, 4  ;;  %s954_s29 = int_to_ptr.vmem [resolvable:$true] %s953_s29 }
  0x3b   :  { %s1219_s30 = scalar_lea.vmem %s954_s29, 512  ;;  %p1224_p11 = scmp.lt.s32.totalorder %s954_s29, %s954_s29 }
  0x3c   :  { %1034 = vmatmul.mubr.msk.bf16.vlgmr.msra.gmra.mrb[0].mxu0 %vm110_vm2, %v1117_v4  ;;  %1044 = vmatpush3.bf16.msra.mxu1 %v1345_v5  ;;  %p1220_p10 = scmp.ne.s32.totalorder %s954_s29, %s1219_s30  ;;  %p1225_p12 = scmp.lt.s32.totalorder %s1219_s30, %s1219_s30 }
  0x3d   :  { %1058 = vmatpush3.bf16.msra.mxu0 %v1340_v2  ;;  %1049 = vmatprep.subr.bf16.mxu1 %v1252_v0 }
  0x3e   :  { %v200_v6 = vld [vmem:[#allocation3] sm:$0xff]  ;;  %1059 = vmatprep.subr.bf16.mxu0 %v1252_v0  ;;  %v260_v20 = vld [vmem:[#allocation4] sm:$0xff]  ;;  %1037 = vmatprep.mubr.msk.bf16.mxu0 %vm110_vm2, %v1119_v53  ;;  %p1226_p13 = por %p1225_p12, %p1224_p11 }
  0x3f   :  { %v202_v7 = vpack.c.bf16 %v200_v6, %v200_v6 }
  0x40   :  { %p1227_p0 = pnand %p1226_p13, %p1220_p10 }
  0x41   :  { %1046 = vmatmul.mubr.msk.bf16.vlgmr.msra.gmra.mrb[0].mxu1 %vm64_vm0, %v202_v7  ;;  %1060 = vmatpush3.bf16.msra.mxu0 %v1345_v5 }
  0x42   :  { %1050 = vmatpush3.bf16.msra.mxu1 %v1340_v2  ;;  %1053 = vmatprep.mubr.msk.bf16.mxu1 %vm1253_vm1, %v1252_v0 }
  0x43   :  { %1051 = vmatprep.subr.bf16.mxu1 %v1252_v0  ;;  %1073 = vmatprep.subr.bf16.mxu0 %v1252_v0 }
  0x44   :  { %1038 = vmatmul.mubr.msk.bf16.gmra.mrb[4].mxu0 %vm110_vm2, %v1120_v54 }
  0x45   :  { %1061 = vmatprep.mubr.msk.bf16.mxu0 %vm1253_vm1, %v1252_v0 }
  0x46   :  { %1052 = vmatpush3.bf16.msra.mxu1 %v1345_v5 }
  0x47   :  { %1065 = vmatprep.subr.bf16.mxu1 %v1252_v0 }
 0x10f   :  { %v1367_v9 = vpop.f32.mrb[0].mxu0 }
 0x110   :  { %v157_v10 = vpop.f32.mrb[1].mxu0  ;;  %v166_v4 = vadd.f32 %v1367_v9, %v1365_v8 }
 0x111   :  { %v158_v11 = vadd.f32 %v1365_v8, %v157_v10  ;;  %v1370_v12 = vpop.f32.mrb[2].mxu0 }
 0x112   :  { %v160_v13 = vpop.f32.mrb[3].mxu0 }
 0x113   :  { %v161_v37 = vadd.f32 %v1365_v8, %v160_v13 }
 0x114   :  { %v253_v14 = vpop.f32.mrb[0].mxu1 }
 0x115   :  { %v259_v15 = vadd.f32 %v253_v14, %v158_v11  ;;  %v1047_v16 = vpop.f32.mrb[1].mxu1 }
 0x116   :  { %v256_v17 = vpop.f32.mrb[2].mxu1 }
 0x117   :  { %1121 = vtanh.f32 %v259_v15  ;;  %v1048_v18 = vpop.f32.mrb[3].mxu1  ;;  %v1406_v59 = vpop.f32.mrb[4].mxu0 }
 0x118   :  { %v1408_v60 = vpop.f32.mrb[5].mxu0 }
 0x119   :  { %v1410_v61 = vpop.f32.mrb[6].mxu0  ;;  %v174_v53 = vadd.f32 %v1365_v8, %v1408_v60 }
 0x11a   :  { %v1412_v62 = vpop.f32.mrb[7].mxu0 }
 0x121   :  { %v1122_v19 = vpop.eup %1121 }
 0x122   :  { %270 = vrot.lane.b32.xlu0 %v1122_v19, %s1254_s26  ;;  %v262_v21 = vmul.f32 0.5, %v1122_v19 }
 0x124   :  { %v263_v22 = vadd.f32 0.5, %v262_v21 }
 0x126   :  { %265 = vrot.lane.b32.xlu0 %v260_v20, %s1249_s27 }
 0x194   :  { %v271_v23 = vpop.permute.xlu0 %270 }
 0x195   :  { %v273_v24 = vmul.f32 %v271_v23, %v263_v22 }
 0x197   :  { %275 = vrot.lane.b32.xlu1 %v273_v24, %s1254_s26 }
 0x198   :  { %v266_v25 = vpop.permute.xlu0 %265 }
 0x199   :  { %v268_v26 = vmul.f32 %v266_v25, %v263_v22 }
 0x209   :  { %v276_v27 = vpop.permute.xlu1 %275 }
 0x20a   :  { %v278_v28 = vadd.f32 %v276_v27, %v268_v26 }
 0x20c   :  { %1123 = vtanh.f32 %v278_v28 }
 0x216   :  { %v1124_v29 = vpop.eup %1123 }
 0x217   :  { %281 = vrot.lane.b32.xlu1 %v1124_v29, %s1254_s26 }
 0x21b   :  { %286 = vrot.lane.b32.xlu1 %v278_v28, %s1249_s27 }
 0x289   :  { %v282_v30 = vpop.permute.xlu1 %281 }
 0x28a   :  { %v1377_v31 = vmul.f32 %v282_v30, %v263_v22  ;;  %v169_v30 = vadd.f32 %v1370_v12, %v1365_v8 }
 0x28c   :  { %291 = vrot.lane.b32.xlu0 %v1377_v31, %s1254_s26 }
 0x28d   :  { %v287_v32 = vpop.permute.xlu1 %286 }
 0x28e   :  { %289 = vst.msk [vmem:[#allocation4] sm:$0xff] %vm64_vm0, %v287_v32 }
 0x295   :  { %v352_v33 = vld [vmem:[#allocation4] sm:$0xff] }
 0x296   :  { %357 = vrot.lane.b32.xlu1 %v352_v33, %s1249_s27 }
 0x2fe   :  { %v292_v34 = vpop.permute.xlu0 %291 }
 0x2ff   :  { %294 = vst.msk [vmem:[#allocation3] sm:$0xff] %vm64_vm0, %v292_v34 }
 0x306   :  { %v304_v35 = vld [vmem:[#allocation3] sm:$0xff] }
 0x307   :  { %v307_v36 = vpack.c.bf16 %v304_v35, %v304_v35 }
 0x308   :  { %v358_v48 = vpop.permute.xlu1 %357 }
 0x309   :  { %1054 = vmatmul.mubr.msk.bf16.vlgmr.msra.gmra.mrb[4].mxu1 %vm64_vm0, %v307_v36 }
 0x30a   :  { %1066 = vmatpush3.bf16.msra.mxu1 %v1340_v2  ;;  %1069 = vmatprep.mubr.msk.bf16.mxu1 %vm1253_vm1, %v1252_v0 }
 0x30b   :  { %1067 = vmatprep.subr.bf16.mxu1 %v1252_v0 }
 0x30e   :  { %1068 = vmatpush3.bf16.msra.mxu1 %v1345_v5 }
 0x30f   :  { %1081 = vmatprep.subr.bf16.mxu1 %v1252_v0 }
 0x3dc   :  { %v345_v38 = vpop.f32.mrb[4].mxu1 }
 0x3dd   :  { %v351_v39 = vadd.f32 %v345_v38, %v161_v37  ;;  %v1055_v40 = vpop.f32.mrb[5].mxu1 }
 0x3de   :  { %v348_v41 = vpop.f32.mrb[6].mxu1 }
 0x3df   :  { %1125 = vtanh.f32 %v351_v39  ;;  %v1056_v42 = vpop.f32.mrb[7].mxu1 }
 0x3e9   :  { %v1126_v43 = vpop.eup %1125 }
 0x3ea   :  { %362 = vrot.lane.b32.xlu0 %v1126_v43, %s1254_s26  ;;  %v354_v44 = vmul.f32 0.5, %v1126_v43 }
 0x3ec   :  { %v355_v45 = vadd.f32 0.5, %v354_v44 }
 0x3ee   :  { %v360_v49 = vmul.f32 %v358_v48, %v355_v45 }
 0x45c   :  { %v363_v46 = vpop.permute.xlu0 %362 }
 0x45d   :  { %v365_v47 = vmul.f32 %v363_v46, %v355_v45 }
 0x45f   :  { %367 = vrot.lane.b32.xlu0 %v365_v47, %s1254_s26 }
 0x4d1   :  { %v368_v50 = vpop.permute.xlu0 %367 }
 0x4d2   :  { %v370_v51 = vadd.f32 %v368_v50, %v360_v49 }
 0x4d4   :  { %1127 = vtanh.f32 %v370_v51 }
 0x4de   :  { %v1128_v52 = vpop.eup %1127 }
 0x4df   :  { %373 = vrot.lane.b32.xlu1 %v1128_v52, %s1254_s26 }
 0x4e3   :  { %378 = vrot.lane.b32.xlu1 %v370_v51, %s1249_s27 }
 0x551   :  { %v374_v55 = vpop.permute.xlu1 %373 }
 0x552   :  { %v1400_v56 = vmul.f32 %v374_v55, %v355_v45 }
 0x554   :  { %383 = vrot.lane.b32.xlu0 %v1400_v56, %s1254_s26 }
 0x555   :  { %v379_v57 = vpop.permute.xlu1 %378 }
 0x556   :  { %381 = vst.msk [vmem:[#allocation4] sm:$0xff] %vm64_vm0, %v379_v57 }
 0x55d   :  { %v444_v58 = vld [vmem:[#allocation4] sm:$0xff] }
 0x55e   :  { %449 = vrot.lane.b32.xlu1 %v444_v58, %s1249_s27 }
 0x5c6   :  { %v384_v63 = vpop.permute.xlu0 %383 }
 0x5c7   :  { %386 = vst.msk [vmem:[#allocation3] sm:$0xff] %vm64_vm0, %v384_v63 }
 0x5ce   :  { %v396_v1 = vld [vmem:[#allocation3] sm:$0xff] }
 0x5cf   :  { %v399_v3 = vpack.c.bf16 %v396_v1, %v396_v1 }
 0x5d0   :  { %v450_v19 = vpop.permute.xlu1 %449 }
 0x5d1   :  { %1062 = vmatmul.mubr.msk.bf16.vlgmr.msra.gmra.mrb[8].mxu0 %vm64_vm0, %v399_v3 }
 0x5d2   :  { %1074 = vmatpush3.bf16.msra.mxu0 %v1340_v2  ;;  %1077 = vmatprep.mubr.msk.bf16.mxu0 %vm1253_vm1, %v1252_v0 }
 0x5d3   :  { %1075 = vmatprep.subr.bf16.mxu0 %v1252_v0 }
 0x5d6   :  { %1076 = vmatpush3.bf16.msra.mxu0 %v1345_v5 }
 0x5d7   :  { %1089 = vmatprep.subr.bf16.mxu0 %v1252_v0 }
 0x6a4   :  { %v437_v6 = vpop.f32.mrb[8].mxu0 }
 0x6a5   :  { %v443_v7 = vadd.f32 %v437_v6, %v166_v4  ;;  %v1063_v10 = vpop.f32.mrb[9].mxu0 }
 0x6a6   :  { %v440_v11 = vpop.f32.mrb[10].mxu0 }
 0x6a7   :  { %1129 = vtanh.f32 %v443_v7  ;;  %v1064_v13 = vpop.f32.mrb[11].mxu0 }
 0x6b1   :  { %v1130_v14 = vpop.eup %1129 }
 0x6b2   :  { %454 = vrot.lane.b32.xlu0 %v1130_v14, %s1254_s26  ;;  %v446_v15 = vmul.f32 0.5, %v1130_v14 }
 0x6b4   :  { %v447_v16 = vadd.f32 0.5, %v446_v15 }
 0x6b6   :  { %v452_v20 = vmul.f32 %v450_v19, %v447_v16 }
 0x724   :  { %v455_v17 = vpop.permute.xlu0 %454 }
 0x725   :  { %v457_v18 = vmul.f32 %v455_v17, %v447_v16 }
 0x727   :  { %459 = vrot.lane.b32.xlu0 %v457_v18, %s1254_s26 }
 0x799   :  { %v460_v21 = vpop.permute.xlu0 %459 }
 0x79a   :  { %v462_v22 = vadd.f32 %v460_v21, %v452_v20 }
 0x79c   :  { %1131 = vtanh.f32 %v462_v22 }
 0x7a6   :  { %v1132_v9 = vpop.eup %1131 }
 0x7a7   :  { %465 = vrot.lane.b32.xlu1 %v1132_v9, %s1254_s26 }
 0x7ab   :  { %470 = vrot.lane.b32.xlu1 %v462_v22, %s1249_s27  ;;  %v177_v22 = vadd.f32 %v1365_v8, %v1412_v62 }
 0x819   :  { %v466_v23 = vpop.permute.xlu1 %465 }
 0x81a   :  { %v1428_v24 = vmul.f32 %v466_v23, %v447_v16 }
 0x81c   :  { %475 = vrot.lane.b32.xlu0 %v1428_v24, %s1254_s26 }
 0x81d   :  { %v471_v25 = vpop.permute.xlu1 %470 }
 0x81e   :  { %473 = vst.msk [vmem:[#allocation4] sm:$0xff] %vm64_vm0, %v471_v25 }
 0x825   :  { %v536_v26 = vld [vmem:[#allocation4] sm:$0xff] }
 0x826   :  { %541 = vrot.lane.b32.xlu1 %v536_v26, %s1249_s27 }
 0x88e   :  { %v476_v27 = vpop.permute.xlu0 %475 }
 0x88f   :  { %478 = vst.msk [vmem:[#allocation3] sm:$0xff] %vm64_vm0, %v476_v27 }
 0x896   :  { %v488_v28 = vld [vmem:[#allocation3] sm:$0xff] }
 0x897   :  { %v491_v29 = vpack.c.bf16 %v488_v28, %v488_v28 }
 0x898   :  { %v542_v42 = vpop.permute.xlu1 %541 }
 0x899   :  { %1070 = vmatmul.mubr.msk.bf16.vlgmr.msra.gmra.mrb[8].mxu1 %vm64_vm0, %v491_v29 }
 0x89a   :  { %1082 = vmatpush3.bf16.msra.mxu1 %v1340_v2  ;;  %1085 = vmatprep.mubr.msk.bf16.mxu1 %vm1253_vm1, %v1252_v0 }
 0x89b   :  { %1083 = vmatprep.subr.bf16.mxu1 %v1252_v0 }
 0x89e   :  { %1084 = vmatpush3.bf16.msra.mxu1 %v1345_v5 }
 0x89f   :  { %1097 = vmatprep.subr.bf16.mxu1 %v1252_v0 }
 0x96c   :  { %v529_v32 = vpop.f32.mrb[8].mxu1 }
 0x96d   :  { %v535_v33 = vadd.f32 %v529_v32, %v169_v30  ;;  %v1071_v34 = vpop.f32.mrb[9].mxu1 }
 0x96e   :  { %v532_v35 = vpop.f32.mrb[10].mxu1 }
 0x96f   :  { %1133 = vtanh.f32 %v535_v33  ;;  %v1072_v36 = vpop.f32.mrb[11].mxu1 }
 0x979   :  { %v1134_v37 = vpop.eup %1133 }
 0x97a   :  { %546 = vrot.lane.b32.xlu0 %v1134_v37, %s1254_s26  ;;  %v538_v38 = vmul.f32 0.5, %v1134_v37 }
 0x97c   :  { %v539_v39 = vadd.f32 0.5, %v538_v38 }
 0x97e   :  { %v544_v43 = vmul.f32 %v542_v42, %v539_v39  ;;  %v182_v42 = vadd.f32 %v1406_v59, %v1365_v8 }
 0x9ec   :  { %v547_v40 = vpop.permute.xlu0 %546 }
 0x9ed   :  { %v549_v41 = vmul.f32 %v547_v40, %v539_v39 }
 0x9ef   :  { %551 = vrot.lane.b32.xlu0 %v549_v41, %s1254_s26 }
 0xa61   :  { %v552_v44 = vpop.permute.xlu0 %551 }
 0xa62   :  { %v554_v45 = vadd.f32 %v552_v44, %v544_v43 }
 0xa64   :  { %1135 = vtanh.f32 %v554_v45 }
 0xa6e   :  { %v1136_v12 = vpop.eup %1135 }
 0xa6f   :  { %557 = vrot.lane.b32.xlu1 %v1136_v12, %s1254_s26 }
 0xa73   :  { %562 = vrot.lane.b32.xlu1 %v554_v45, %s1249_s27 }
 0xae1   :  { %v558_v46 = vpop.permute.xlu1 %557 }
 0xae2   :  { %v1448_v47 = vmul.f32 %v558_v46, %v539_v39 }
 0xae4   :  { %567 = vrot.lane.b32.xlu0 %v1448_v47, %s1254_s26 }
 0xae5   :  { %v563_v48 = vpop.permute.xlu1 %562 }
 0xae6   :  { %565 = vst.msk [vmem:[#allocation4] sm:$0xff] %vm64_vm0, %v563_v48 }
 0xaed   :  { %v628_v49 = vld [vmem:[#allocation4] sm:$0xff] }
 0xaee   :  { %633 = vrot.lane.b32.xlu1 %v628_v49, %s1249_s27 }
 0xb56   :  { %v568_v50 = vpop.permute.xlu0 %567 }
 0xb57   :  { %570 = vst.msk [vmem:[#allocation3] sm:$0xff] %vm64_vm0, %v568_v50 }
 0xb5e   :  { %v580_v51 = vld [vmem:[#allocation3] sm:$0xff] }
 0xb5f   :  { %v583_v52 = vpack.c.bf16 %v580_v51, %v580_v51 }
 0xb60   :  { %v634_v10 = vpop.permute.xlu1 %633 }
 0xb61   :  { %1078 = vmatmul.mubr.msk.bf16.vlgmr.msra.gmra.mrb[12].mxu0 %vm64_vm0, %v583_v52 }
 0xb62   :  { %1090 = vmatpush3.bf16.msra.mxu0 %v1340_v2  ;;  %1093 = vmatprep.mubr.msk.bf16.mxu0 %vm1253_vm1, %v1252_v0 }
 0xb63   :  { %1091 = vmatprep.subr.bf16.mxu0 %v1252_v0 }
 0xb66   :  { %1092 = vmatpush3.bf16.msra.mxu0 %v1345_v5 }
 0xc34   :  { %v621_v54 = vpop.f32.mrb[12].mxu0 }
 0xc35   :  { %v627_v55 = vadd.f32 %v621_v54, %v174_v53  ;;  %v1079_v57 = vpop.f32.mrb[13].mxu0 }
 0xc36   :  { %v624_v58 = vpop.f32.mrb[14].mxu0 }
 0xc37   :  { %1137 = vtanh.f32 %v627_v55  ;;  %v1080_v63 = vpop.f32.mrb[15].mxu0 }
 0xc41   :  { %v1138_v1 = vpop.eup %1137 }
 0xc42   :  { %638 = vrot.lane.b32.xlu0 %v1138_v1, %s1254_s26  ;;  %v630_v3 = vmul.f32 0.5, %v1138_v1 }
 0xc44   :  { %v631_v4 = vadd.f32 0.5, %v630_v3 }
 0xc46   :  { %v636_v11 = vmul.f32 %v634_v10, %v631_v4  ;;  %v185_v10 = vadd.f32 %v1410_v61, %v1365_v8  ;;  %v996_v8 = vpack.c.bf16 %v1428_v24, %v1428_v24 }
 0xcb4   :  { %v639_v6 = vpop.permute.xlu0 %638 }
 0xcb5   :  { %v641_v7 = vmul.f32 %v639_v6, %v631_v4 }
 0xcb7   :  { %643 = vrot.lane.b32.xlu0 %v641_v7, %s1254_s26 }
 0xd29   :  { %v644_v13 = vpop.permute.xlu0 %643 }
 0xd2a   :  { %v646_v14 = vadd.f32 %v644_v13, %v636_v11 }
 0xd2c   :  { %1139 = vtanh.f32 %v646_v14 }
 0xd36   :  { %v1140_v60 = vpop.eup %1139 }
 0xd37   :  { %649 = vrot.lane.b32.xlu1 %v1140_v60, %s1254_s26 }
 0xd3b   :  { %654 = vrot.lane.b32.xlu1 %v646_v14, %s1249_s27 }
 0xda9   :  { %v650_v15 = vpop.permute.xlu1 %649 }
 0xdaa   :  { %v1467_v16 = vmul.f32 %v650_v15, %v631_v4 }
 0xdac   :  { %659 = vrot.lane.b32.xlu0 %v1467_v16, %s1254_s26  ;;  %v998_v61 = vpack.c.bf16 %v1467_v16, %v1467_v16 }
 0xdad   :  { %v655_v17 = vpop.permute.xlu1 %654 }
 0xdae   :  { %657 = vst.msk [vmem:[#allocation4] sm:$0xff] %vm64_vm0, %v655_v17 }
 0xdb5   :  { %v720_v18 = vld [vmem:[#allocation4] sm:$0xff] }
 0xdb6   :  { %725 = vrot.lane.b32.xlu1 %v720_v18, %s1249_s27 }
 0xe1e   :  { %v660_v19 = vpop.permute.xlu0 %659 }
 0xe1f   :  { %662 = vst.msk [vmem:[#allocation3] sm:$0xff] %vm64_vm0, %v660_v19 }
 0xe26   :  { %v672_v20 = vld [vmem:[#allocation3] sm:$0xff] }
 0xe27   :  { %v675_v21 = vpack.c.bf16 %v672_v20, %v672_v20 }
 0xe29   :  { %1086 = vmatmul.mubr.msk.bf16.vlgmr.msra.gmra.mrb[12].mxu1 %vm64_vm0, %v675_v21 }
 0xe2a   :  { %1098 = vmatpush3.bf16.msra.mxu1 %v1340_v2  ;;  %1101 = vmatprep.mubr.msk.bf16.mxu1 %vm1253_vm1, %v1252_v0 }
 0xe2b   :  { %1099 = vmatprep.subr.bf16.mxu1 %v1252_v0  ;;  %v726_v0 = vpop.permute.xlu1 %725 }
 0xe2e   :  { %1100 = vmatpush3.bf16.msra.mxu1 %v1345_v5 }
 0xefc   :  { %v713_v9 = vpop.f32.mrb[12].mxu1 }
 0xefd   :  { %v719_v23 = vadd.f32 %v713_v9, %v177_v22  ;;  %v1087_v25 = vpop.f32.mrb[13].mxu1  ;;  %v994_v22 = vpack.c.bf16 %v1377_v31, %v1377_v31 }
 0xefe   :  { %v716_v26 = vpop.f32.mrb[14].mxu1 }
 0xeff   :  { %1141 = vtanh.f32 %v719_v23  ;;  %v1088_v27 = vpop.f32.mrb[15].mxu1 }
 0xf09   :  { %v1142_v28 = vpop.eup %1141 }
 0xf0a   :  { %730 = vrot.lane.b32.xlu0 %v1142_v28, %s1254_s26  ;;  %v722_v2 = vmul.f32 0.5, %v1142_v28 }
 0xf0c   :  { %v723_v29 = vadd.f32 0.5, %v722_v2  ;;  %v995_v2 = vpack.c.bf16 %v1400_v56, %v1400_v56 }
 0xf0e   :  { %v728_v5 = vmul.f32 %v726_v0, %v723_v29 }
 0xf7c   :  { %v731_v30 = vpop.permute.xlu0 %730 }
 0xf7d   :  { %v733_v32 = vmul.f32 %v731_v30, %v723_v29  ;;  %v997_v30 = vpack.c.bf16 %v1448_v47, %v1448_v47 }
 0xf7f   :  { %735 = vrot.lane.b32.xlu0 %v733_v32, %s1254_s26 }
 0xff1   :  { %v736_v33 = vpop.permute.xlu0 %735 }
 0xff2   :  { %v738_v34 = vadd.f32 %v736_v33, %v728_v5 }
 0xff4   :  { %1143 = vtanh.f32 %v738_v34 }
 0xffe   :  { %v1144_v62 = vpop.eup %1143 }
 0xfff   :  { %741 = vrot.lane.b32.xlu1 %v1144_v62, %s1254_s26 }
0x1003   :  { %746 = vrot.lane.b32.xlu1 %v738_v34, %s1249_s27 }
0x1071   :  { %v742_v35 = vpop.permute.xlu1 %741 }
0x1072   :  { %v1486_v36 = vmul.f32 %v742_v35, %v723_v29 }
0x1074   :  { %751 = vrot.lane.b32.xlu0 %v1486_v36, %s1254_s26  ;;  %v999_v32 = vpack.c.bf16 %v1486_v36, %v1486_v36 }
0x1075   :  { %v747_v37 = vpop.permute.xlu1 %746 }
0x1076   :  { %749 = vst.msk [vmem:[#allocation4] sm:$0xff] %vm64_vm0, %v747_v37 }
0x107d   :  { %v812_v38 = vld [vmem:[#allocation4] sm:$0xff] }
0x107e   :  { %817 = vrot.lane.b32.xlu1 %v812_v38, %s1249_s27 }
0x10e6   :  { %v752_v39 = vpop.permute.xlu0 %751 }
0x10e7   :  { %754 = vst.msk [vmem:[#allocation3] sm:$0xff] %vm64_vm0, %v752_v39 }
0x10ee   :  { %v764_v40 = vld [vmem:[#allocation3] sm:$0xff] }
0x10ef   :  { %v767_v41 = vpack.c.bf16 %v764_v40, %v764_v40 }
0x10f0   :  { %v818_v53 = vpop.permute.xlu1 %817 }
0x10f1   :  { %1094 = vmatmul.mubr.msk.bf16.vlgmr.msra.gmra.mrb[16].mxu0 %vm64_vm0, %v767_v41 }
0x11c4   :  { %v805_v43 = vpop.f32.mrb[16].mxu0 }
0x11c5   :  { %v811_v44 = vadd.f32 %v805_v43, %v182_v42  ;;  %v1095_v45 = vpop.f32.mrb[17].mxu0 }
0x11c6   :  { %v808_v12 = vpop.f32.mrb[18].mxu0 }
0x11c7   :  { %1145 = vtanh.f32 %v811_v44  ;;  %v1096_v46 = vpop.f32.mrb[19].mxu0 }
0x11d1   :  { %v1146_v48 = vpop.eup %1145 }
0x11d2   :  { %822 = vrot.lane.b32.xlu0 %v1146_v48, %s1254_s26  ;;  %v814_v49 = vmul.f32 0.5, %v1146_v48 }
0x11d4   :  { %v815_v50 = vadd.f32 0.5, %v814_v49 }
0x11d6   :  { %v820_v54 = vmul.f32 %v818_v53, %v815_v50 }
0x1244   :  { %v823_v51 = vpop.permute.xlu0 %822 }
0x1245   :  { %v825_v52 = vmul.f32 %v823_v51, %v815_v50 }
0x1247   :  { %827 = vrot.lane.b32.xlu0 %v825_v52, %s1254_s26 }
0x12b9   :  { %v828_v55 = vpop.permute.xlu0 %827 }
0x12ba   :  { %v830_v57 = vadd.f32 %v828_v55, %v820_v54 }
0x12bc   :  { %1147 = vtanh.f32 %v830_v57 }
0x12c6   :  { %v1148_v59 = vpop.eup %1147 }
0x12c7   :  { %833 = vrot.lane.b32.xlu1 %v1148_v59, %s1254_s26 }
0x12cb   :  { %838 = vrot.lane.b32.xlu1 %v830_v57, %s1249_s27 }
0x1339   :  { %v834_v58 = vpop.permute.xlu1 %833 }
0x133a   :  { %v836_v63 = vmul.f32 %v834_v58, %v815_v50 }
0x133c   :  { %843 = vrot.lane.b32.xlu0 %v836_v63, %s1254_s26  ;;  %v1000_v9 = vpack.c.bf16 %v836_v63, %v836_v63 }
0x133d   :  { %v839_v1 = vpop.permute.xlu1 %838 }
0x133e   :  { %841 = vst.msk [vmem:[#allocation4] sm:$0xff] %vm64_vm0, %v839_v1 }
0x1345   :  { %v904_v3 = vld [vmem:[#allocation4] sm:$0xff] }
0x1346   :  { %909 = vrot.lane.b32.xlu1 %v904_v3, %s1249_s27 }
0x13ae   :  { %v844_v4 = vpop.permute.xlu0 %843 }
0x13af   :  { %846 = vst.msk [vmem:[#allocation3] sm:$0xff] %vm64_vm0, %v844_v4 }
0x13b6   :  { %v856_v6 = vld [vmem:[#allocation3] sm:$0xff] }
0x13b7   :  { %v859_v7 = vpack.c.bf16 %v856_v6, %v856_v6 }
0x13b8   :  { %v910_v23 = vpop.permute.xlu1 %909 }
0x13b9   :  { %1102 = vmatmul.mubr.msk.bf16.vlgmr.msra.gmra.mrb[16].mxu1 %vm64_vm0, %v859_v7 }
0x148c   :  { %v897_v11 = vpop.f32.mrb[16].mxu1 }
0x148d   :  { %v903_v13 = vadd.f32 %v897_v11, %v185_v10  ;;  %v1103_v14 = vpop.f32.mrb[17].mxu1 }
0x148e   :  { %v900_v60 = vpop.f32.mrb[18].mxu1 }
0x148f   :  { %1149 = vtanh.f32 %v903_v13  ;;  %v1104_v15 = vpop.f32.mrb[19].mxu1 }
0x1499   :  { %v1150_v17 = vpop.eup %1149 }
0x149a   :  { %914 = vrot.lane.b32.xlu0 %v1150_v17, %s1254_s26  ;;  %v906_v18 = vmul.f32 0.5, %v1150_v17 }
0x149c   :  { %v907_v19 = vadd.f32 0.5, %v906_v18 }
0x149e   :  { %v912_v25 = vmul.f32 %v910_v23, %v907_v19 }
0x150c   :  { %v915_v20 = vpop.permute.xlu0 %914 }
0x150d   :  { %v917_v21 = vmul.f32 %v915_v20, %v907_v19 }
0x150f   :  { %919 = vrot.lane.b32.xlu0 %v917_v21, %s1254_s26 }
0x1513   :  { %299 = vrot.lane.b32.xlu0 %v994_v22, %s1254_s26 }
0x1517   :  { %483 = vrot.lane.b32.xlu0 %v996_v8, %s1254_s26 }
0x151b   :  { %667 = vrot.lane.b32.xlu0 %v998_v61, %s1254_s26 }
0x151f   :  { %851 = vrot.lane.b32.xlu0 %v1000_v9, %s1254_s26 }
0x1581   :  { %v920_v26 = vpop.permute.xlu0 %919 }
0x1582   :  { %v922_v27 = vadd.f32 %v920_v26, %v912_v25 }
0x1584   :  { %1151 = vtanh.f32 %v922_v27  ;;  %930 = vrot.lane.b32.xlu0 %v922_v27, %s1249_s27 }
0x1585   :  { %v300_v31 = vpop.permute.xlu0 %299 }
0x1586   :  { %303 = vst.msk [vmem:[#allocation11] sm:$0xf] %vm302_vm3, %v300_v31 }
0x1589   :  { %v484_v24 = vpop.permute.xlu0 %483 }
0x158a   :  { %487 = vst.msk [vmem:[#allocation11 + $0x8] sm:$0xf] %vm302_vm3, %v484_v24 }
0x158d   :  { %v668_v16 = vpop.permute.xlu0 %667 }
0x158e   :  { %v1152_v28 = vpop.eup %1151  ;;  %671 = vst.msk [vmem:[#allocation11 + $0x10] sm:$0xf] %vm302_vm3, %v668_v16 }
0x158f   :  { %925 = vrot.lane.b32.xlu1 %v1152_v28, %s1254_s26 }
0x1591   :  { %v852_v29 = vpop.permute.xlu0 %851 }
0x1592   :  { %855 = vst.msk [vmem:[#allocation11 + $0x18] sm:$0xf] %vm302_vm3, %v852_v29 }
0x1593   :  { %391 = vrot.lane.b32.xlu1 %v995_v2, %s1254_s26 }
0x1597   :  { %575 = vrot.lane.b32.xlu1 %v997_v30, %s1254_s26 }
0x159b   :  { %759 = vrot.lane.b32.xlu1 %v999_v32, %s1254_s26 }
0x15f6   :  { %v931_v0 = vpop.permute.xlu0 %930 }
0x15f7   :  { %933 = vst.msk [vmem:[#allocation4] sm:$0xff] %vm64_vm0, %v931_v0 }
0x1601   :  { %v926_v5 = vpop.permute.xlu1 %925 }
0x1602   :  { %v928_v56 = vmul.f32 %v926_v5, %v907_v19 }
0x1604   :  { %v1001_v33 = vpack.c.bf16 %v928_v56, %v928_v56 }
0x1605   :  { %v392_v34 = vpop.permute.xlu1 %391 }
0x1606   :  { %395 = vst.msk [vmem:[#allocation11 + $0x4] sm:$0xf] %vm302_vm3, %v392_v34  ;;  %943 = vrot.lane.b32.xlu1 %v1001_v33, %s1254_s26 }
0x1609   :  { %v576_v62 = vpop.permute.xlu1 %575 }
0x160a   :  { %579 = vst.msk [vmem:[#allocation11 + $0xc] sm:$0xf] %vm302_vm3, %v576_v62  ;;  %935 = vrot.lane.b32.xlu1 %v928_v56, %s1254_s26 }
0x160d   :  { %v760_v47 = vpop.permute.xlu1 %759 }
0x160e   :  { %763 = vst.msk [vmem:[#allocation11 + $0x14] sm:$0xf] %vm302_vm3, %v760_v47 }
0x1678   :  { %v944_v35 = vpop.permute.xlu1 %943 }
0x1679   :  { %947 = vst.msk [vmem:[#allocation11 + $0x1c] sm:$0xf] %vm302_vm3, %v944_v35 }
0x167a   :  { %1230 = shalt.err (!%p1227_p0)
}
0x167b   :  { %s1231_s7 = scalar_lea.hbm %s1561_s4, 512 }
0x167c   :  { %p1232_p1 = scmp.ne.s32.totalorder %s1561_s4, %s1231_s7  ;;  %p1235_p2 = scmp.lt.u32.totalorder %s1231_s7, %s1561_s4 }
0x167e   :  { %p1237_p3 = pnand %p1235_p2, %p1232_p1 }
0x1680   :  { %1240 = shalt.err (!%p1237_p3)
}
0x1681   :  { %959 = dma.vmem_to_hbm [thread:$0]  %s954_s29, 512, %s1561_s4, [#allocation7], %s1249_s27, %s1249_s27, %s1250_s28   ;;  %v936_v36 = vpop.permute.xlu1 %935 }
0x1682   :  { %938 = vst.msk [vmem:[#allocation3] sm:$0xff] %vm64_vm0, %v936_v36 }
0x1683   :  { %1245 = dma.done.wait [#allocation7], 512  }
0x1684   :  { %1246 = vsyncadd [#allocation7], 4294966784 }
0x1685   :  { %963 = vsyncpa [#allocation6], 1 }
0x1686   :  { %964 = vsyncpa [#allocation9], 1 }
0x1687   :  { %965 = vsyncpa [#allocation7], 1 }

</bundles_post_ra>
